<compile_context>
chip_gen: v7x
topology: tpu7x:2x2x1
jax: 0.10.0
libtpu: 0.0.40
codegen_flags: <defaults>
</compile_context>

<pallas_src>
import math
import functools

import jax
import jax.numpy as jnp
from jax import lax  # noqa: F401  (kept for parity with other kernels)
from jax.experimental import pallas as pl
from jax.experimental.pallas import tpu as pltpu

# ---------------- configuration (mirrors TransformerBlockConfig) -------------
B = 2            # batch
N = 8            # sequence length
D_MODEL = 32     # d_model
NHEAD = 4        # n_head
D_FF = 64        # dim_feedforward (= config.d_in)
N_LAYERS = 2     # n_layers
DROPOUT_P = 0.1  # TODO(synk): dropout is an eval-mode identity here
LN_EPS = 1e-5
NEG_INF = -1e9


# ------------------------------- Pallas kernel -------------------------------
def transformer_block_kernel(x_ref, bias_ref, w_ref, v_ref, o_ref, *,
                             n_head, n_layers):
    """One batch element, all layers, in one grid step.

    x_ref:    (1, N, D)         activations (f32)
    bias_ref: (1, 1, N)  slim additive key bias  OR  (1, H, N, N) full bias
    w_ref:    (L, 3D+DFF, 3D)   packed bf16 matrices, rows = [Wqkv | Wo | W1 | W2]
    v_ref:    (L, 8, 3D)        packed f32 vectors:
                                rows = [b_qkv, bo, ln1_g, ln1_b, b1, b2, ln2_g, ln2_b]
    o_ref:    (1, N, D)
    """
    _, N_, D_ = x_ref.shape
    H = n_head
    hd = D_ // H
    F = w_ref.shape[1] - 3 * D_
    scale = 1.0 / math.sqrt(hd)

    x2 = x_ref[0].astype(jnp.float32)            # (N, D)
    bias = bias_ref[0].astype(jnp.float32)       # (1, N) or (H, N, N); both
                                                 # broadcast against (H, N, N)

    def layer_norm(t, g, b):
        mu = jnp.mean(t, axis=-1, keepdims=True)
        var = jnp.mean((t - mu) ** 2, axis=-1, keepdims=True)
        return (t - mu) * jax.lax.rsqrt(var + LN_EPS) * g + b

    # Static layer loop (L=2) -> fully unrolled at trace time.
    for l in range(n_layers):
        # --- packed weight slices (static, 8/16-aligned row offsets) ---
        w_qkv = w_ref[l, 0:D_, :]                    # (D, 3D)  bf16
        w_o = w_ref[l, D_:2 * D_, 0:D_]              # (D, D)   bf16
        w_1 = w_ref[l, 2 * D_:3 * D_, 0:F]           # (D, F)   bf16
        w_2 = w_ref[l, 3 * D_:3 * D_ + F, 0:D_]      # (F, D)   bf16
        b_qkv = v_ref[l, 0:1, :]                     # (1, 3D)  f32
        b_o = v_ref[l, 1:2, 0:D_]
        g1 = v_ref[l, 2:3, 0:D_]
        be1 = v_ref[l, 3:4, 0:D_]
        b_1 = v_ref[l, 4:5, 0:F]
        b_2 = v_ref[l, 5:6, 0:D_]
        g2 = v_ref[l, 6:7, 0:D_]
        be2 = v_ref[l, 7:8, 0:D_]

        # --- fused QKV projection: one lane-dense MXU matmul ---
        qkv = jnp.dot(x2.astype(jnp.bfloat16), w_qkv,
                      preferred_element_type=jnp.float32) + b_qkv   # (N, 3D)
        qkv_b = qkv.astype(jnp.bfloat16)

        # Head split: layout-only static slices (no per-head compute).
        q = jnp.stack([qkv_b[:, h * hd:(h + 1) * hd] for h in range(H)])
        k = jnp.stack([qkv_b[:, D_ + h * hd:D_ + (h + 1) * hd]
                       for h in range(H)])
        v = jnp.stack([qkv_b[:, 2 * D_ + h * hd:2 * D_ + (h + 1) * hd]
                       for h in range(H)])                          # (H, N, hd)

        # --- batched attention over all heads, single softmax ---
        s = jnp.einsum("hqd,hkd->hqk", q, k,
                       preferred_element_type=jnp.float32) * scale  # (H, N, N)
        s = s + bias
        s = s - jnp.max(s, axis=-1, keepdims=True)
        p = jnp.exp(s)
        p = p * pl.reciprocal(jnp.sum(p, axis=-1, keepdims=True), approx=True)
        o = jnp.einsum("hqk,hkd->hqd", p.astype(jnp.bfloat16), v,
                       preferred_element_type=jnp.float32)          # (H, N, hd)
        o2 = jnp.concatenate([o[h] for h in range(H)], axis=-1)     # (N, D)

        # --- single full-width output projection ---
        attn = jnp.dot(o2.astype(jnp.bfloat16), w_o,
                       preferred_element_type=jnp.float32) + b_o

        # --- residual + LayerNorm 1 (post-norm) ---
        y = layer_norm(x2 + attn, g1, be1)

        # --- feed-forward (relu) ---
        h1 = jnp.dot(y.astype(jnp.bfloat16), w_1,
                     preferred_element_type=jnp.float32) + b_1
        h1 = jnp.maximum(h1, 0.0)
        ff = jnp.dot(h1.astype(jnp.bfloat16), w_2,
                     preferred_element_type=jnp.float32) + b_2

        # --- residual + LayerNorm 2 ---
        x2 = layer_norm(y + ff, g2, be2)

    o_ref[0] = x2.astype(o_ref.dtype)


# ------------------------------ glue / wrapper --------------------------------
def pack_params(layer_params):
    """Pack per-layer params into two lane-dense blobs (2 DMAs total).

    w_blob: (L, 3D+DFF, 3D) bf16, rows = [Wqkv | Wo | W1 | W2], zero-padded
            to a common 3D-lane width.
    v_blob: (L, 8, 3D) f32, rows = [b_qkv, bo, g1, beta1, b1, b2, g2, beta2].
    """
    d, wmax = D_MODEL, 3 * D_MODEL
    w_rows, v_rows = [], []
    for p in layer_params:
        def padw(m):
            return jnp.pad(m, ((0, 0), (0, wmax - m.shape[1])))

        def padv(v):
            return jnp.pad(v, (0, wmax - v.shape[0]))[None, :]

        w_qkv = jnp.concatenate([p["wq"], p["wk"], p["wv"]], axis=1)  # (D, 3D)
        mat = jnp.concatenate(
            [padw(w_qkv), padw(p["wo"]), padw(p["w1"]), padw(p["w2"])], axis=0)
        vec = jnp.concatenate(
            [padv(jnp.concatenate([p["bq"], p["bk"], p["bv"]])),
             padv(p["bo"]), padv(p["g1"]), padv(p["beta1"]),
             padv(p["b1"]), padv(p["b2"]), padv(p["g2"]), padv(p["beta2"])],
            axis=0)
        w_rows.append(mat)
        v_rows.append(vec)
    w_blob = jnp.stack(w_rows).astype(jnp.bfloat16)   # (L, 3D+DFF, 3D)
    v_blob = jnp.stack(v_rows).astype(jnp.float32)    # (L, 8, 3D)
    return w_blob, v_blob


def build_key_bias(b, n, key_padding_mask):
    """Slim (B, 1, N) additive key bias (True in mask => ignored)."""
    if key_padding_mask is None:
        return jnp.zeros((b, 1, n), jnp.float32)
    kpm = jnp.asarray(key_padding_mask)
    if kpm.ndim == 1:
        kpm = jnp.broadcast_to(kpm[None, :], (b, n))
    return jnp.where(kpm, NEG_INF, 0.0).astype(jnp.float32)[:, None, :]


def build_full_bias(b, nhead, n, key_padding_mask, src_mask):
    """Full (B, H, N, N) additive bias (needed only when src_mask is given)."""
    bias = jnp.zeros((b, nhead, n, n), jnp.float32)
    if key_padding_mask is not None:
        kpm = jnp.asarray(key_padding_mask)
        if kpm.ndim == 1:
            kpm = jnp.broadcast_to(kpm[None, :], (b, n))
        bias = bias + jnp.where(kpm, NEG_INF, 0.0)[:, None, None, :]
    if src_mask is not None:
        bias = bias + jnp.asarray(src_mask, jnp.float32).reshape(b, nhead, n, n)
    return bias


def transformer_block_pallas(x, bias, w_blob, v_blob, *, n_head):
    """Single pallas_call; grid over batch so v7x shards across both TCs."""
    b, n, d = x.shape
    n_layers = w_blob.shape[0]
    if bias.ndim == 3:       # slim (B, 1, N) key-padding bias
        bias_spec = pl.BlockSpec((1, 1, n), lambda i: (i, 0, 0))
    else:                    # full (B, H, N, N) bias (src_mask path)
        bias_spec = pl.BlockSpec((1, n_head, n, n), lambda i: (i, 0, 0, 0))
    kernel = functools.partial(transformer_block_kernel,
                               n_head=n_head, n_layers=n_layers)
    return pl.pallas_call(
        kernel,
        out_shape=jax.ShapeDtypeStruct((b, n, d), x.dtype),
        grid=(b,),
        in_specs=[
            pl.BlockSpec((1, n, d), lambda i: (i, 0, 0)),
            bias_spec,
            # Constant index maps: weight blobs stay VMEM-resident, no re-DMA.
            pl.BlockSpec(w_blob.shape, lambda i: (0, 0, 0)),
            pl.BlockSpec(v_blob.shape, lambda i: (0, 0, 0)),
        ],
        out_specs=pl.BlockSpec((1, n, d), lambda i: (i, 0, 0)),
        compiler_params=pltpu.CompilerParams(
            dimension_semantics=("parallel",)),
    )(x, bias, w_blob, v_blob)


def transformer_block_forward(x, layer_params, key_padding_mask=None,
                              src_mask=None):
    """Mirrors TransformerBlock.forward (dropout == identity in eval mode)."""
    # TODO(synk): nn.Dropout(p=0.1) (input + in-layer dropouts) is an
    # eval-mode identity here; no RNG-based dropout is applied.
    b, n, _ = x.shape
    w_blob, v_blob = pack_params(layer_params)
    if src_mask is None:
        bias = build_key_bias(b, n, key_padding_mask)               # (B, 1, N)
    else:
        bias = build_full_bias(b, NHEAD, n, key_padding_mask, src_mask)
    return transformer_block_pallas(x, bias, w_blob, v_blob, n_head=NHEAD)


# ------------------------------ reference (jnp) --------------------------------
def reference_layer(x, bias_bhnn, p):
    b, n, d = x.shape
    hd = d // NHEAD
    q = x @ p["wq"] + p["bq"]
    k = x @ p["wk"] + p["bk"]
    v = x @ p["wv"] + p["bv"]

    def split(t):  # (B, N, D) -> (B, H, N, hd)
        return t.reshape(b, n, NHEAD, hd).transpose(0, 2, 1, 3)

    q, k, v = split(q), split(k), split(v)
    s = jnp.einsum("bhqd,bhkd->bhqk", q, k) / math.sqrt(hd) + bias_bhnn
    pattn = jax.nn.softmax(s, axis=-1)
    o = jnp.einsum("bhqk,bhkd->bhqd", pattn, v)
    o = o.transpose(0, 2, 1, 3).reshape(b, n, d)
    o = o @ p["wo"] + p["bo"]

    def ln(t, g, be):
        mu = jnp.mean(t, -1, keepdims=True)
        var = jnp.mean((t - mu) ** 2, -1, keepdims=True)
        return (t - mu) * jax.lax.rsqrt(var + LN_EPS) * g + be

    y = ln(x + o, p["g1"], p["beta1"])
    ff = jnp.maximum(y @ p["w1"] + p["b1"], 0.0) @ p["w2"] + p["b2"]
    return ln(y + ff, p["g2"], p["beta2"])


def reference_forward(x, layer_params, key_padding_mask=None, src_mask=None):
    b, n, _ = x.shape
    bias = build_full_bias(b, NHEAD, n, key_padding_mask, src_mask)
    out = x
    for p in layer_params:
        out = reference_layer(out, bias, p)
    return out


# ------------------------------- param init -----------------------------------
def init_layer_params(key):
    ks = jax.random.split(key, 12)
    s_in = 1.0 / math.sqrt(D_MODEL)
    s_ff = 1.0 / math.sqrt(D_FF)
    u = jax.random.uniform
    return {
        "wq": u(ks[0], (D_MODEL, D_MODEL), jnp.float32, -s_in, s_in),
        "wk": u(ks[1], (D_MODEL, D_MODEL), jnp.float32, -s_in, s_in),
        "wv": u(ks[2], (D_MODEL, D_MODEL), jnp.float32, -s_in, s_in),
        "bq": u(ks[3], (D_MODEL,), jnp.float32, -s_in, s_in),
        "bk": u(ks[4], (D_MODEL,), jnp.float32, -s_in, s_in),
        "bv": u(ks[5], (D_MODEL,), jnp.float32, -s_in, s_in),
        "wo": u(ks[6], (D_MODEL, D_MODEL), jnp.float32, -s_in, s_in),
        "bo": u(ks[7], (D_MODEL,), jnp.float32, -s_in, s_in),
        "g1": jnp.ones((D_MODEL,), jnp.float32),
        "beta1": jnp.zeros((D_MODEL,), jnp.float32),
        "w1": u(ks[8], (D_MODEL, D_FF), jnp.float32, -s_in, s_in),
        "b1": u(ks[9], (D_FF,), jnp.float32, -s_in, s_in),
        "w2": u(ks[10], (D_FF, D_MODEL), jnp.float32, -s_ff, s_ff),
        "b2": u(ks[11], (D_MODEL,), jnp.float32, -s_ff, s_ff),
        "g2": jnp.ones((D_MODEL,), jnp.float32),
        "beta2": jnp.zeros((D_MODEL,), jnp.float32),
    }


if __name__ == "__main__":
    root = jax.random.PRNGKey(0)
    k_x, k_mask, *k_layers = jax.random.split(root, 2 + N_LAYERS)

    x = jax.random.normal(k_x, (B, N, D_MODEL), jnp.float32)
    # key_padding_mask: True means "ignore this position" (pad tail of b=1)
    key_padding_mask = jnp.zeros((B, N), bool).at[1, N - 2:].set(True)

    layer_params = [init_layer_params(k) for k in k_layers]

    out = transformer_block_forward(x, layer_params, key_padding_mask, None)
    out = jax.block_until_ready(out)

    ref = reference_forward(x, layer_params, key_padding_mask, None)
    assert out.shape == (B, N, D_MODEL)
    # Tolerance reflects bf16 MXU operands + approx softmax reciprocal vs the
    # pure-f32 reference (per perf review; elementwise math stays f32).
    assert jnp.allclose(out, ref, atol=5e-2, rtol=2e-2), "mismatch vs reference"

    print("KERNEL_OK")
</pallas_src>

<mosaic_0001>
module attributes {stable_mosaic.version = 11 : i64} {
  func.func @transformer_block_kernel(%arg0: i32, %arg1: memref<1x8x32xf32, #tpu.memory_space<vmem>>, %arg2: memref<1x1x8xf32, #tpu.memory_space<vmem>>, %arg3: memref<2x160x96xbf16, #tpu.memory_space<vmem>>, %arg4: memref<2x8x96xf32, #tpu.memory_space<vmem>>, %arg5: memref<1x8x32xf32, #tpu.memory_space<vmem>>) attributes {dimension_semantics = [#tpu.dimension_semantics<parallel>], iteration_bounds = array<i64: 2>, scalar_prefetch = 0 : i64, scratch_operands = 0 : i64, tpu.core_type = #tpu.core_type<tc>, window_params = [{transform_indices = @transform_0, window_bounds = array<i64: 1, 8, 32>}, {transform_indices = @transform_1, window_bounds = array<i64: 1, 1, 8>}, {pipeline_mode = #tpu.pipeline_mode<synchronous>, transform_indices = @transform_2, window_bounds = array<i64: 2, 160, 96>}, {pipeline_mode = #tpu.pipeline_mode<synchronous>, transform_indices = @transform_3, window_bounds = array<i64: 2, 8, 96>}, {transform_indices = @transform_4, window_bounds = array<i64: 1, 8, 32>}]} {
    %c0 = arith.constant 0 : index
    %c0_0 = arith.constant 0 : index
    %c0_1 = arith.constant 0 : index
    %0 = vector.load %arg1[%c0, %c0_0, %c0_1] : memref<1x8x32xf32, #tpu.memory_space<vmem>>, vector<1x8x32xf32>
    %1 = vector.shape_cast %0 : vector<1x8x32xf32> to vector<8x32xf32>
    %c0_2 = arith.constant 0 : index
    %c0_3 = arith.constant 0 : index
    %c0_4 = arith.constant 0 : index
    %2 = vector.load %arg2[%c0_2, %c0_3, %c0_4] : memref<1x1x8xf32, #tpu.memory_space<vmem>>, vector<1x1x8xf32>
    %3 = vector.shape_cast %2 : vector<1x1x8xf32> to vector<1x8xf32>
    %c0_5 = arith.constant 0 : index
    %c0_6 = arith.constant 0 : index
    %c0_7 = arith.constant 0 : index
    %4 = vector.load %arg3[%c0_5, %c0_6, %c0_7] : memref<2x160x96xbf16, #tpu.memory_space<vmem>>, vector<1x32x96xbf16>
    %5 = vector.shape_cast %4 : vector<1x32x96xbf16> to vector<32x96xbf16>
    %c0_8 = arith.constant 0 : index
    %c32 = arith.constant 32 : index
    %c0_9 = arith.constant 0 : index
    %6 = vector.load %arg3[%c0_8, %c32, %c0_9] : memref<2x160x96xbf16, #tpu.memory_space<vmem>>, vector<1x32x32xbf16>
    %7 = vector.shape_cast %6 : vector<1x32x32xbf16> to vector<32x32xbf16>
    %c0_10 = arith.constant 0 : index
    %c64 = arith.constant 64 : index
    %c0_11 = arith.constant 0 : index
    %8 = vector.load %arg3[%c0_10, %c64, %c0_11] : memref<2x160x96xbf16, #tpu.memory_space<vmem>>, vector<1x32x64xbf16>
    %9 = vector.shape_cast %8 : vector<1x32x64xbf16> to vector<32x64xbf16>
    %c0_12 = arith.constant 0 : index
    %c96 = arith.constant 96 : index
    %c0_13 = arith.constant 0 : index
    %10 = vector.load %arg3[%c0_12, %c96, %c0_13] : memref<2x160x96xbf16, #tpu.memory_space<vmem>>, vector<1x64x32xbf16>
    %11 = vector.shape_cast %10 : vector<1x64x32xbf16> to vector<64x32xbf16>
    %c0_14 = arith.constant 0 : index
    %c0_15 = arith.constant 0 : index
    %c0_16 = arith.constant 0 : index
    %12 = vector.load %arg4[%c0_14, %c0_15, %c0_16] : memref<2x8x96xf32, #tpu.memory_space<vmem>>, vector<1x1x96xf32>
    %13 = vector.shape_cast %12 : vector<1x1x96xf32> to vector<1x96xf32>
    %c0_17 = arith.constant 0 : index
    %c1 = arith.constant 1 : index
    %c0_18 = arith.constant 0 : index
    %14 = vector.load %arg4[%c0_17, %c1, %c0_18] : memref<2x8x96xf32, #tpu.memory_space<vmem>>, vector<1x1x32xf32>
    %15 = vector.shape_cast %14 : vector<1x1x32xf32> to vector<1x32xf32>
    %c0_19 = arith.constant 0 : index
    %c2 = arith.constant 2 : index
    %c0_20 = arith.constant 0 : index
    %16 = vector.load %arg4[%c0_19, %c2, %c0_20] : memref<2x8x96xf32, #tpu.memory_space<vmem>>, vector<1x1x32xf32>
    %17 = vector.shape_cast %16 : vector<1x1x32xf32> to vector<1x32xf32>
    %c0_21 = arith.constant 0 : index
    %c3 = arith.constant 3 : index
    %c0_22 = arith.constant 0 : index
    %18 = vector.load %arg4[%c0_21, %c3, %c0_22] : memref<2x8x96xf32, #tpu.memory_space<vmem>>, vector<1x1x32xf32>
    %19 = vector.shape_cast %18 : vector<1x1x32xf32> to vector<1x32xf32>
    %c0_23 = arith.constant 0 : index
    %c4 = arith.constant 4 : index
    %c0_24 = arith.constant 0 : index
    %20 = vector.load %arg4[%c0_23, %c4, %c0_24] : memref<2x8x96xf32, #tpu.memory_space<vmem>>, vector<1x1x64xf32>
    %21 = vector.shape_cast %20 : vector<1x1x64xf32> to vector<1x64xf32>
    %c0_25 = arith.constant 0 : index
    %c5 = arith.constant 5 : index
    %c0_26 = arith.constant 0 : index
    %22 = vector.load %arg4[%c0_25, %c5, %c0_26] : memref<2x8x96xf32, #tpu.memory_space<vmem>>, vector<1x1x32xf32>
    %23 = vector.shape_cast %22 : vector<1x1x32xf32> to vector<1x32xf32>
    %c0_27 = arith.constant 0 : index
    %c6 = arith.constant 6 : index
    %c0_28 = arith.constant 0 : index
    %24 = vector.load %arg4[%c0_27, %c6, %c0_28] : memref<2x8x96xf32, #tpu.memory_space<vmem>>, vector<1x1x32xf32>
    %25 = vector.shape_cast %24 : vector<1x1x32xf32> to vector<1x32xf32>
    %c0_29 = arith.constant 0 : index
    %c7 = arith.constant 7 : index
    %c0_30 = arith.constant 0 : index
    %26 = vector.load %arg4[%c0_29, %c7, %c0_30] : memref<2x8x96xf32, #tpu.memory_space<vmem>>, vector<1x1x32xf32>
    %27 = vector.shape_cast %26 : vector<1x1x32xf32> to vector<1x32xf32>
    %28 = arith.truncf %1 : vector<8x32xf32> to vector<8x32xbf16>
    %cst = arith.constant dense<0.000000e+00> : vector<8x96xf32>
    %29 = tpu.matmul %28, %5, %cst {dimension_numbers = #tpu.dot_dimension_numbers<[1], [0], [0], [1], [0, 0, 1, 1], [], []>} : vector<8x32xbf16>, vector<32x96xbf16>, vector<8x96xf32> -> vector<8x96xf32>
    %30 = vector.broadcast %13 : vector<1x96xf32> to vector<8x96xf32>
    %31 = arith.addf %29, %30 : vector<8x96xf32>
    %32 = arith.truncf %31 : vector<8x96xf32> to vector<8x96xbf16>
    %33 = vector.extract_strided_slice %32 {offsets = [0, 0], sizes = [8, 8], strides = [1, 1]} : vector<8x96xbf16> to vector<8x8xbf16>
    %34 = vector.extract_strided_slice %32 {offsets = [0, 8], sizes = [8, 8], strides = [1, 1]} : vector<8x96xbf16> to vector<8x8xbf16>
    %35 = vector.extract_strided_slice %32 {offsets = [0, 16], sizes = [8, 8], strides = [1, 1]} : vector<8x96xbf16> to vector<8x8xbf16>
    %36 = vector.extract_strided_slice %32 {offsets = [0, 24], sizes = [8, 8], strides = [1, 1]} : vector<8x96xbf16> to vector<8x8xbf16>
    %37 = vector.shape_cast %33 : vector<8x8xbf16> to vector<1x8x8xbf16>
    %38 = vector.shape_cast %34 : vector<8x8xbf16> to vector<1x8x8xbf16>
    %39 = vector.shape_cast %35 : vector<8x8xbf16> to vector<1x8x8xbf16>
    %40 = vector.shape_cast %36 : vector<8x8xbf16> to vector<1x8x8xbf16>
    %41 = tpu.concatenate %37, %38, %39, %40 in 0 : vector<1x8x8xbf16>, vector<1x8x8xbf16>, vector<1x8x8xbf16>, vector<1x8x8xbf16> -> vector<4x8x8xbf16>
    %42 = vector.extract_strided_slice %32 {offsets = [0, 32], sizes = [8, 8], strides = [1, 1]} : vector<8x96xbf16> to vector<8x8xbf16>
    %43 = vector.extract_strided_slice %32 {offsets = [0, 40], sizes = [8, 8], strides = [1, 1]} : vector<8x96xbf16> to vector<8x8xbf16>
    %44 = vector.extract_strided_slice %32 {offsets = [0, 48], sizes = [8, 8], strides = [1, 1]} : vector<8x96xbf16> to vector<8x8xbf16>
    %45 = vector.extract_strided_slice %32 {offsets = [0, 56], sizes = [8, 8], strides = [1, 1]} : vector<8x96xbf16> to vector<8x8xbf16>
    %46 = vector.shape_cast %42 : vector<8x8xbf16> to vector<1x8x8xbf16>
    %47 = vector.shape_cast %43 : vector<8x8xbf16> to vector<1x8x8xbf16>
    %48 = vector.shape_cast %44 : vector<8x8xbf16> to vector<1x8x8xbf16>
    %49 = vector.shape_cast %45 : vector<8x8xbf16> to vector<1x8x8xbf16>
    %50 = tpu.concatenate %46, %47, %48, %49 in 0 : vector<1x8x8xbf16>, vector<1x8x8xbf16>, vector<1x8x8xbf16>, vector<1x8x8xbf16> -> vector<4x8x8xbf16>
    %51 = vector.extract_strided_slice %32 {offsets = [0, 64], sizes = [8, 8], strides = [1, 1]} : vector<8x96xbf16> to vector<8x8xbf16>
    %52 = vector.extract_strided_slice %32 {offsets = [0, 72], sizes = [8, 8], strides = [1, 1]} : vector<8x96xbf16> to vector<8x8xbf16>
    %53 = vector.extract_strided_slice %32 {offsets = [0, 80], sizes = [8, 8], strides = [1, 1]} : vector<8x96xbf16> to vector<8x8xbf16>
    %54 = vector.extract_strided_slice %32 {offsets = [0, 88], sizes = [8, 8], strides = [1, 1]} : vector<8x96xbf16> to vector<8x8xbf16>
    %55 = vector.shape_cast %51 : vector<8x8xbf16> to vector<1x8x8xbf16>
    %56 = vector.shape_cast %52 : vector<8x8xbf16> to vector<1x8x8xbf16>
    %57 = vector.shape_cast %53 : vector<8x8xbf16> to vector<1x8x8xbf16>
    %58 = vector.shape_cast %54 : vector<8x8xbf16> to vector<1x8x8xbf16>
    %59 = tpu.concatenate %55, %56, %57, %58 in 0 : vector<1x8x8xbf16>, vector<1x8x8xbf16>, vector<1x8x8xbf16>, vector<1x8x8xbf16> -> vector<4x8x8xbf16>
    "tpu.trace_start"() <{level = 10 : i32, message = "hqd,hkd->hqk"}> : () -> ()
    %cst_31 = arith.constant dense<0.000000e+00> : vector<4x8x8xf32>
    %60 = tpu.matmul %41, %50, %cst_31 {dimension_numbers = #tpu.dot_dimension_numbers<[2], [2], [1], [1], [0, 0, 0, 1, 1, 1], [0], [0]>} : vector<4x8x8xbf16>, vector<4x8x8xbf16>, vector<4x8x8xf32> -> vector<4x8x8xf32>
    "tpu.trace_stop"() : () -> ()
    %cst_32 = arith.constant 0.353553385 : f32
    %61 = vector.broadcast %cst_32 : f32 to vector<4x8x8xf32>
    %62 = arith.mulf %60, %61 : vector<4x8x8xf32>
    %63 = vector.shape_cast %3 : vector<1x8xf32> to vector<1x1x8xf32>
    %64 = vector.broadcast %63 : vector<1x1x8xf32> to vector<4x8x8xf32>
    %65 = arith.addf %62, %64 : vector<4x8x8xf32>
    %cst_33 = arith.constant dense<0xFF800000> : vector<4x8xf32>
    %66 = vector.multi_reduction <maximumf>, %65, %cst_33 [2] : vector<4x8x8xf32> to vector<4x8xf32>
    %67 = vector.shape_cast %66 : vector<4x8xf32> to vector<4x8x1xf32>
    %68 = vector.broadcast %67 : vector<4x8x1xf32> to vector<4x8x8xf32>
    %69 = arith.subf %65, %68 : vector<4x8x8xf32>
    %70 = math.exp %69 : vector<4x8x8xf32>
    %cst_34 = arith.constant dense<0.000000e+00> : vector<4x8xf32>
    %71 = vector.multi_reduction <add>, %70, %cst_34 [2] : vector<4x8x8xf32> to vector<4x8xf32>
    %72 = vector.shape_cast %71 : vector<4x8xf32> to vector<4x8x1xf32>
    %73 = tpu.reciprocal %72 {approx = true} : vector<4x8x1xf32> -> vector<4x8x1xf32>
    %74 = vector.broadcast %73 : vector<4x8x1xf32> to vector<4x8x8xf32>
    %75 = arith.mulf %70, %74 : vector<4x8x8xf32>
    %76 = arith.truncf %75 : vector<4x8x8xf32> to vector<4x8x8xbf16>
    "tpu.trace_start"() <{level = 10 : i32, message = "hqk,hkd->hqd"}> : () -> ()
    %cst_35 = arith.constant dense<0.000000e+00> : vector<4x8x8xf32>
    %77 = tpu.matmul %76, %59, %cst_35 {dimension_numbers = #tpu.dot_dimension_numbers<[2], [1], [1], [2], [0, 0, 0, 1, 1, 2], [0], [0]>} : vector<4x8x8xbf16>, vector<4x8x8xbf16>, vector<4x8x8xf32> -> vector<4x8x8xf32>
    "tpu.trace_stop"() : () -> ()
    %78 = vector.extract_strided_slice %77 {offsets = [0, 0, 0], sizes = [1, 8, 8], strides = [1, 1, 1]} : vector<4x8x8xf32> to vector<1x8x8xf32>
    %79 = vector.shape_cast %78 : vector<1x8x8xf32> to vector<8x8xf32>
    %80 = vector.extract_strided_slice %77 {offsets = [1, 0, 0], sizes = [1, 8, 8], strides = [1, 1, 1]} : vector<4x8x8xf32> to vector<1x8x8xf32>
    %81 = vector.shape_cast %80 : vector<1x8x8xf32> to vector<8x8xf32>
    %82 = vector.extract_strided_slice %77 {offsets = [2, 0, 0], sizes = [1, 8, 8], strides = [1, 1, 1]} : vector<4x8x8xf32> to vector<1x8x8xf32>
    %83 = vector.shape_cast %82 : vector<1x8x8xf32> to vector<8x8xf32>
    %84 = vector.extract_strided_slice %77 {offsets = [3, 0, 0], sizes = [1, 8, 8], strides = [1, 1, 1]} : vector<4x8x8xf32> to vector<1x8x8xf32>
    %85 = vector.shape_cast %84 : vector<1x8x8xf32> to vector<8x8xf32>
    %86 = tpu.concatenate %79, %81, %83, %85 in 1 : vector<8x8xf32>, vector<8x8xf32>, vector<8x8xf32>, vector<8x8xf32> -> vector<8x32xf32>
    %87 = arith.truncf %86 : vector<8x32xf32> to vector<8x32xbf16>
    %cst_36 = arith.constant dense<0.000000e+00> : vector<8x32xf32>
    %88 = tpu.matmul %87, %7, %cst_36 {dimension_numbers = #tpu.dot_dimension_numbers<[1], [0], [0], [1], [0, 0, 1, 1], [], []>} : vector<8x32xbf16>, vector<32x32xbf16>, vector<8x32xf32> -> vector<8x32xf32>
    %89 = vector.broadcast %15 : vector<1x32xf32> to vector<8x32xf32>
    %90 = arith.addf %88, %89 : vector<8x32xf32>
    %91 = arith.addf %1, %90 : vector<8x32xf32>
    %cst_37 = arith.constant dense<0.000000e+00> : vector<8xf32>
    %92 = vector.multi_reduction <add>, %91, %cst_37 [1] : vector<8x32xf32> to vector<8xf32>
    %93 = vector.shape_cast %92 : vector<8xf32> to vector<8x1xf32>
    %cst_38 = arith.constant 3.200000e+01 : f32
    %94 = vector.broadcast %cst_38 : f32 to vector<8x1xf32>
    %95 = arith.divf %93, %94 : vector<8x1xf32>
    %96 = vector.broadcast %95 : vector<8x1xf32> to vector<8x32xf32>
    %97 = arith.subf %91, %96 : vector<8x32xf32>
    %98 = arith.mulf %97, %97 : vector<8x32xf32>
    %cst_39 = arith.constant dense<0.000000e+00> : vector<8xf32>
    %99 = vector.multi_reduction <add>, %98, %cst_39 [1] : vector<8x32xf32> to vector<8xf32>
    %100 = vector.shape_cast %99 : vector<8xf32> to vector<8x1xf32>
    %cst_40 = arith.constant 3.200000e+01 : f32
    %101 = vector.broadcast %cst_40 : f32 to vector<8x1xf32>
    %102 = arith.divf %100, %101 : vector<8x1xf32>
    %103 = vector.broadcast %95 : vector<8x1xf32> to vector<8x32xf32>
    %104 = arith.subf %91, %103 : vector<8x32xf32>
    %cst_41 = arith.constant 9.99999974E-6 : f32
    %105 = vector.broadcast %cst_41 : f32 to vector<8x1xf32>
    %106 = arith.addf %102, %105 : vector<8x1xf32>
    %107 = math.rsqrt %106 : vector<8x1xf32>
    %108 = vector.broadcast %107 : vector<8x1xf32> to vector<8x32xf32>
    %109 = arith.mulf %104, %108 : vector<8x32xf32>
    %110 = vector.broadcast %17 : vector<1x32xf32> to vector<8x32xf32>
    %111 = arith.mulf %109, %110 : vector<8x32xf32>
    %112 = vector.broadcast %19 : vector<1x32xf32> to vector<8x32xf32>
    %113 = arith.addf %111, %112 : vector<8x32xf32>
    %114 = arith.truncf %113 : vector<8x32xf32> to vector<8x32xbf16>
    %cst_42 = arith.constant dense<0.000000e+00> : vector<8x64xf32>
    %115 = tpu.matmul %114, %9, %cst_42 {dimension_numbers = #tpu.dot_dimension_numbers<[1], [0], [0], [1], [0, 0, 1, 1], [], []>} : vector<8x32xbf16>, vector<32x64xbf16>, vector<8x64xf32> -> vector<8x64xf32>
    %116 = vector.broadcast %21 : vector<1x64xf32> to vector<8x64xf32>
    %117 = arith.addf %115, %116 : vector<8x64xf32>
    %cst_43 = arith.constant 0.000000e+00 : f32
    %118 = vector.broadcast %cst_43 : f32 to vector<8x64xf32>
    %119 = arith.maximumf %117, %118 : vector<8x64xf32>
    %120 = arith.truncf %119 : vector<8x64xf32> to vector<8x64xbf16>
    %cst_44 = arith.constant dense<0.000000e+00> : vector<8x32xf32>
    %121 = tpu.matmul %120, %11, %cst_44 {dimension_numbers = #tpu.dot_dimension_numbers<[1], [0], [0], [1], [0, 0, 1, 1], [], []>} : vector<8x64xbf16>, vector<64x32xbf16>, vector<8x32xf32> -> vector<8x32xf32>
    %122 = vector.broadcast %23 : vector<1x32xf32> to vector<8x32xf32>
    %123 = arith.addf %121, %122 : vector<8x32xf32>
    %124 = arith.addf %113, %123 : vector<8x32xf32>
    %cst_45 = arith.constant dense<0.000000e+00> : vector<8xf32>
    %125 = vector.multi_reduction <add>, %124, %cst_45 [1] : vector<8x32xf32> to vector<8xf32>
    %126 = vector.shape_cast %125 : vector<8xf32> to vector<8x1xf32>
    %cst_46 = arith.constant 3.200000e+01 : f32
    %127 = vector.broadcast %cst_46 : f32 to vector<8x1xf32>
    %128 = arith.divf %126, %127 : vector<8x1xf32>
    %129 = vector.broadcast %128 : vector<8x1xf32> to vector<8x32xf32>
    %130 = arith.subf %124, %129 : vector<8x32xf32>
    %131 = arith.mulf %130, %130 : vector<8x32xf32>
    %cst_47 = arith.constant dense<0.000000e+00> : vector<8xf32>
    %132 = vector.multi_reduction <add>, %131, %cst_47 [1] : vector<8x32xf32> to vector<8xf32>
    %133 = vector.shape_cast %132 : vector<8xf32> to vector<8x1xf32>
    %cst_48 = arith.constant 3.200000e+01 : f32
    %134 = vector.broadcast %cst_48 : f32 to vector<8x1xf32>
    %135 = arith.divf %133, %134 : vector<8x1xf32>
    %136 = vector.broadcast %128 : vector<8x1xf32> to vector<8x32xf32>
    %137 = arith.subf %124, %136 : vector<8x32xf32>
    %cst_49 = arith.constant 9.99999974E-6 : f32
    %138 = vector.broadcast %cst_49 : f32 to vector<8x1xf32>
    %139 = arith.addf %135, %138 : vector<8x1xf32>
    %140 = math.rsqrt %139 : vector<8x1xf32>
    %141 = vector.broadcast %140 : vector<8x1xf32> to vector<8x32xf32>
    %142 = arith.mulf %137, %141 : vector<8x32xf32>
    %143 = vector.broadcast %25 : vector<1x32xf32> to vector<8x32xf32>
    %144 = arith.mulf %142, %143 : vector<8x32xf32>
    %145 = vector.broadcast %27 : vector<1x32xf32> to vector<8x32xf32>
    %146 = arith.addf %144, %145 : vector<8x32xf32>
    %c1_50 = arith.constant 1 : index
    %c0_51 = arith.constant 0 : index
    %c0_52 = arith.constant 0 : index
    %147 = vector.load %arg3[%c1_50, %c0_51, %c0_52] : memref<2x160x96xbf16, #tpu.memory_space<vmem>>, vector<1x32x96xbf16>
    %148 = vector.shape_cast %147 : vector<1x32x96xbf16> to vector<32x96xbf16>
    %c1_53 = arith.constant 1 : index
    %c32_54 = arith.constant 32 : index
    %c0_55 = arith.constant 0 : index
    %149 = vector.load %arg3[%c1_53, %c32_54, %c0_55] : memref<2x160x96xbf16, #tpu.memory_space<vmem>>, vector<1x32x32xbf16>
    %150 = vector.shape_cast %149 : vector<1x32x32xbf16> to vector<32x32xbf16>
    %c1_56 = arith.constant 1 : index
    %c64_57 = arith.constant 64 : index
    %c0_58 = arith.constant 0 : index
    %151 = vector.load %arg3[%c1_56, %c64_57, %c0_58] : memref<2x160x96xbf16, #tpu.memory_space<vmem>>, vector<1x32x64xbf16>
    %152 = vector.shape_cast %151 : vector<1x32x64xbf16> to vector<32x64xbf16>
    %c1_59 = arith.constant 1 : index
    %c96_60 = arith.constant 96 : index
    %c0_61 = arith.constant 0 : index
    %153 = vector.load %arg3[%c1_59, %c96_60, %c0_61] : memref<2x160x96xbf16, #tpu.memory_space<vmem>>, vector<1x64x32xbf16>
    %154 = vector.shape_cast %153 : vector<1x64x32xbf16> to vector<64x32xbf16>
    %c1_62 = arith.constant 1 : index
    %c0_63 = arith.constant 0 : index
    %c0_64 = arith.constant 0 : index
    %155 = vector.load %arg4[%c1_62, %c0_63, %c0_64] : memref<2x8x96xf32, #tpu.memory_space<vmem>>, vector<1x1x96xf32>
    %156 = vector.shape_cast %155 : vector<1x1x96xf32> to vector<1x96xf32>
    %c1_65 = arith.constant 1 : index
    %c1_66 = arith.constant 1 : index
    %c0_67 = arith.constant 0 : index
    %157 = vector.load %arg4[%c1_65, %c1_66, %c0_67] : memref<2x8x96xf32, #tpu.memory_space<vmem>>, vector<1x1x32xf32>
    %158 = vector.shape_cast %157 : vector<1x1x32xf32> to vector<1x32xf32>
    %c1_68 = arith.constant 1 : index
    %c2_69 = arith.constant 2 : index
    %c0_70 = arith.constant 0 : index
    %159 = vector.load %arg4[%c1_68, %c2_69, %c0_70] : memref<2x8x96xf32, #tpu.memory_space<vmem>>, vector<1x1x32xf32>
    %160 = vector.shape_cast %159 : vector<1x1x32xf32> to vector<1x32xf32>
    %c1_71 = arith.constant 1 : index
    %c3_72 = arith.constant 3 : index
    %c0_73 = arith.constant 0 : index
    %161 = vector.load %arg4[%c1_71, %c3_72, %c0_73] : memref<2x8x96xf32, #tpu.memory_space<vmem>>, vector<1x1x32xf32>
    %162 = vector.shape_cast %161 : vector<1x1x32xf32> to vector<1x32xf32>
    %c1_74 = arith.constant 1 : index
    %c4_75 = arith.constant 4 : index
    %c0_76 = arith.constant 0 : index
    %163 = vector.load %arg4[%c1_74, %c4_75, %c0_76] : memref<2x8x96xf32, #tpu.memory_space<vmem>>, vector<1x1x64xf32>
    %164 = vector.shape_cast %163 : vector<1x1x64xf32> to vector<1x64xf32>
    %c1_77 = arith.constant 1 : index
    %c5_78 = arith.constant 5 : index
    %c0_79 = arith.constant 0 : index
    %165 = vector.load %arg4[%c1_77, %c5_78, %c0_79] : memref<2x8x96xf32, #tpu.memory_space<vmem>>, vector<1x1x32xf32>
    %166 = vector.shape_cast %165 : vector<1x1x32xf32> to vector<1x32xf32>
    %c1_80 = arith.constant 1 : index
    %c6_81 = arith.constant 6 : index
    %c0_82 = arith.constant 0 : index
    %167 = vector.load %arg4[%c1_80, %c6_81, %c0_82] : memref<2x8x96xf32, #tpu.memory_space<vmem>>, vector<1x1x32xf32>
    %168 = vector.shape_cast %167 : vector<1x1x32xf32> to vector<1x32xf32>
    %c1_83 = arith.constant 1 : index
    %c7_84 = arith.constant 7 : index
    %c0_85 = arith.constant 0 : index
    %169 = vector.load %arg4[%c1_83, %c7_84, %c0_85] : memref<2x8x96xf32, #tpu.memory_space<vmem>>, vector<1x1x32xf32>
    %170 = vector.shape_cast %169 : vector<1x1x32xf32> to vector<1x32xf32>
    %171 = arith.truncf %146 : vector<8x32xf32> to vector<8x32xbf16>
    %cst_86 = arith.constant dense<0.000000e+00> : vector<8x96xf32>
    %172 = tpu.matmul %171, %148, %cst_86 {dimension_numbers = #tpu.dot_dimension_numbers<[1], [0], [0], [1], [0, 0, 1, 1], [], []>} : vector<8x32xbf16>, vector<32x96xbf16>, vector<8x96xf32> -> vector<8x96xf32>
    %173 = vector.broadcast %156 : vector<1x96xf32> to vector<8x96xf32>
    %174 = arith.addf %172, %173 : vector<8x96xf32>
    %175 = arith.truncf %174 : vector<8x96xf32> to vector<8x96xbf16>
    %176 = vector.extract_strided_slice %175 {offsets = [0, 0], sizes = [8, 8], strides = [1, 1]} : vector<8x96xbf16> to vector<8x8xbf16>
    %177 = vector.extract_strided_slice %175 {offsets = [0, 8], sizes = [8, 8], strides = [1, 1]} : vector<8x96xbf16> to vector<8x8xbf16>
    %178 = vector.extract_strided_slice %175 {offsets = [0, 16], sizes = [8, 8], strides = [1, 1]} : vector<8x96xbf16> to vector<8x8xbf16>
    %179 = vector.extract_strided_slice %175 {offsets = [0, 24], sizes = [8, 8], strides = [1, 1]} : vector<8x96xbf16> to vector<8x8xbf16>
    %180 = vector.shape_cast %176 : vector<8x8xbf16> to vector<1x8x8xbf16>
    %181 = vector.shape_cast %177 : vector<8x8xbf16> to vector<1x8x8xbf16>
    %182 = vector.shape_cast %178 : vector<8x8xbf16> to vector<1x8x8xbf16>
    %183 = vector.shape_cast %179 : vector<8x8xbf16> to vector<1x8x8xbf16>
    %184 = tpu.concatenate %180, %181, %182, %183 in 0 : vector<1x8x8xbf16>, vector<1x8x8xbf16>, vector<1x8x8xbf16>, vector<1x8x8xbf16> -> vector<4x8x8xbf16>
    %185 = vector.extract_strided_slice %175 {offsets = [0, 32], sizes = [8, 8], strides = [1, 1]} : vector<8x96xbf16> to vector<8x8xbf16>
    %186 = vector.extract_strided_slice %175 {offsets = [0, 40], sizes = [8, 8], strides = [1, 1]} : vector<8x96xbf16> to vector<8x8xbf16>
    %187 = vector.extract_strided_slice %175 {offsets = [0, 48], sizes = [8, 8], strides = [1, 1]} : vector<8x96xbf16> to vector<8x8xbf16>
    %188 = vector.extract_strided_slice %175 {offsets = [0, 56], sizes = [8, 8], strides = [1, 1]} : vector<8x96xbf16> to vector<8x8xbf16>
    %189 = vector.shape_cast %185 : vector<8x8xbf16> to vector<1x8x8xbf16>
    %190 = vector.shape_cast %186 : vector<8x8xbf16> to vector<1x8x8xbf16>
    %191 = vector.shape_cast %187 : vector<8x8xbf16> to vector<1x8x8xbf16>
    %192 = vector.shape_cast %188 : vector<8x8xbf16> to vector<1x8x8xbf16>
    %193 = tpu.concatenate %189, %190, %191, %192 in 0 : vector<1x8x8xbf16>, vector<1x8x8xbf16>, vector<1x8x8xbf16>, vector<1x8x8xbf16> -> vector<4x8x8xbf16>
    %194 = vector.extract_strided_slice %175 {offsets = [0, 64], sizes = [8, 8], strides = [1, 1]} : vector<8x96xbf16> to vector<8x8xbf16>
    %195 = vector.extract_strided_slice %175 {offsets = [0, 72], sizes = [8, 8], strides = [1, 1]} : vector<8x96xbf16> to vector<8x8xbf16>
    %196 = vector.extract_strided_slice %175 {offsets = [0, 80], sizes = [8, 8], strides = [1, 1]} : vector<8x96xbf16> to vector<8x8xbf16>
    %197 = vector.extract_strided_slice %175 {offsets = [0, 88], sizes = [8, 8], strides = [1, 1]} : vector<8x96xbf16> to vector<8x8xbf16>
    %198 = vector.shape_cast %194 : vector<8x8xbf16> to vector<1x8x8xbf16>
    %199 = vector.shape_cast %195 : vector<8x8xbf16> to vector<1x8x8xbf16>
    %200 = vector.shape_cast %196 : vector<8x8xbf16> to vector<1x8x8xbf16>
    %201 = vector.shape_cast %197 : vector<8x8xbf16> to vector<1x8x8xbf16>
    %202 = tpu.concatenate %198, %199, %200, %201 in 0 : vector<1x8x8xbf16>, vector<1x8x8xbf16>, vector<1x8x8xbf16>, vector<1x8x8xbf16> -> vector<4x8x8xbf16>
    "tpu.trace_start"() <{level = 10 : i32, message = "hqd,hkd->hqk"}> : () -> ()
    %cst_87 = arith.constant dense<0.000000e+00> : vector<4x8x8xf32>
    %203 = tpu.matmul %184, %193, %cst_87 {dimension_numbers = #tpu.dot_dimension_numbers<[2], [2], [1], [1], [0, 0, 0, 1, 1, 1], [0], [0]>} : vector<4x8x8xbf16>, vector<4x8x8xbf16>, vector<4x8x8xf32> -> vector<4x8x8xf32>
    "tpu.trace_stop"() : () -> ()
    %cst_88 = arith.constant 0.353553385 : f32
    %204 = vector.broadcast %cst_88 : f32 to vector<4x8x8xf32>
    %205 = arith.mulf %203, %204 : vector<4x8x8xf32>
    %206 = vector.shape_cast %3 : vector<1x8xf32> to vector<1x1x8xf32>
    %207 = vector.broadcast %206 : vector<1x1x8xf32> to vector<4x8x8xf32>
    %208 = arith.addf %205, %207 : vector<4x8x8xf32>
    %cst_89 = arith.constant dense<0xFF800000> : vector<4x8xf32>
    %209 = vector.multi_reduction <maximumf>, %208, %cst_89 [2] : vector<4x8x8xf32> to vector<4x8xf32>
    %210 = vector.shape_cast %209 : vector<4x8xf32> to vector<4x8x1xf32>
    %211 = vector.broadcast %210 : vector<4x8x1xf32> to vector<4x8x8xf32>
    %212 = arith.subf %208, %211 : vector<4x8x8xf32>
    %213 = math.exp %212 : vector<4x8x8xf32>
    %cst_90 = arith.constant dense<0.000000e+00> : vector<4x8xf32>
    %214 = vector.multi_reduction <add>, %213, %cst_90 [2] : vector<4x8x8xf32> to vector<4x8xf32>
    %215 = vector.shape_cast %214 : vector<4x8xf32> to vector<4x8x1xf32>
    %216 = tpu.reciprocal %215 {approx = true} : vector<4x8x1xf32> -> vector<4x8x1xf32>
    %217 = vector.broadcast %216 : vector<4x8x1xf32> to vector<4x8x8xf32>
    %218 = arith.mulf %213, %217 : vector<4x8x8xf32>
    %219 = arith.truncf %218 : vector<4x8x8xf32> to vector<4x8x8xbf16>
    "tpu.trace_start"() <{level = 10 : i32, message = "hqk,hkd->hqd"}> : () -> ()
    %cst_91 = arith.constant dense<0.000000e+00> : vector<4x8x8xf32>
    %220 = tpu.matmul %219, %202, %cst_91 {dimension_numbers = #tpu.dot_dimension_numbers<[2], [1], [1], [2], [0, 0, 0, 1, 1, 2], [0], [0]>} : vector<4x8x8xbf16>, vector<4x8x8xbf16>, vector<4x8x8xf32> -> vector<4x8x8xf32>
    "tpu.trace_stop"() : () -> ()
    %221 = vector.extract_strided_slice %220 {offsets = [0, 0, 0], sizes = [1, 8, 8], strides = [1, 1, 1]} : vector<4x8x8xf32> to vector<1x8x8xf32>
    %222 = vector.shape_cast %221 : vector<1x8x8xf32> to vector<8x8xf32>
    %223 = vector.extract_strided_slice %220 {offsets = [1, 0, 0], sizes = [1, 8, 8], strides = [1, 1, 1]} : vector<4x8x8xf32> to vector<1x8x8xf32>
    %224 = vector.shape_cast %223 : vector<1x8x8xf32> to vector<8x8xf32>
    %225 = vector.extract_strided_slice %220 {offsets = [2, 0, 0], sizes = [1, 8, 8], strides = [1, 1, 1]} : vector<4x8x8xf32> to vector<1x8x8xf32>
    %226 = vector.shape_cast %225 : vector<1x8x8xf32> to vector<8x8xf32>
    %227 = vector.extract_strided_slice %220 {offsets = [3, 0, 0], sizes = [1, 8, 8], strides = [1, 1, 1]} : vector<4x8x8xf32> to vector<1x8x8xf32>
    %228 = vector.shape_cast %227 : vector<1x8x8xf32> to vector<8x8xf32>
    %229 = tpu.concatenate %222, %224, %226, %228 in 1 : vector<8x8xf32>, vector<8x8xf32>, vector<8x8xf32>, vector<8x8xf32> -> vector<8x32xf32>
    %230 = arith.truncf %229 : vector<8x32xf32> to vector<8x32xbf16>
    %cst_92 = arith.constant dense<0.000000e+00> : vector<8x32xf32>
    %231 = tpu.matmul %230, %150, %cst_92 {dimension_numbers = #tpu.dot_dimension_numbers<[1], [0], [0], [1], [0, 0, 1, 1], [], []>} : vector<8x32xbf16>, vector<32x32xbf16>, vector<8x32xf32> -> vector<8x32xf32>
    %232 = vector.broadcast %158 : vector<1x32xf32> to vector<8x32xf32>
    %233 = arith.addf %231, %232 : vector<8x32xf32>
    %234 = arith.addf %146, %233 : vector<8x32xf32>
    %cst_93 = arith.constant dense<0.000000e+00> : vector<8xf32>
    %235 = vector.multi_reduction <add>, %234, %cst_93 [1] : vector<8x32xf32> to vector<8xf32>
    %236 = vector.shape_cast %235 : vector<8xf32> to vector<8x1xf32>
    %cst_94 = arith.constant 3.200000e+01 : f32
    %237 = vector.broadcast %cst_94 : f32 to vector<8x1xf32>
    %238 = arith.divf %236, %237 : vector<8x1xf32>
    %239 = vector.broadcast %238 : vector<8x1xf32> to vector<8x32xf32>
    %240 = arith.subf %234, %239 : vector<8x32xf32>
    %241 = arith.mulf %240, %240 : vector<8x32xf32>
    %cst_95 = arith.constant dense<0.000000e+00> : vector<8xf32>
    %242 = vector.multi_reduction <add>, %241, %cst_95 [1] : vector<8x32xf32> to vector<8xf32>
    %243 = vector.shape_cast %242 : vector<8xf32> to vector<8x1xf32>
    %cst_96 = arith.constant 3.200000e+01 : f32
    %244 = vector.broadcast %cst_96 : f32 to vector<8x1xf32>
    %245 = arith.divf %243, %244 : vector<8x1xf32>
    %246 = vector.broadcast %238 : vector<8x1xf32> to vector<8x32xf32>
    %247 = arith.subf %234, %246 : vector<8x32xf32>
    %cst_97 = arith.constant 9.99999974E-6 : f32
    %248 = vector.broadcast %cst_97 : f32 to vector<8x1xf32>
    %249 = arith.addf %245, %248 : vector<8x1xf32>
    %250 = math.rsqrt %249 : vector<8x1xf32>
    %251 = vector.broadcast %250 : vector<8x1xf32> to vector<8x32xf32>
    %252 = arith.mulf %247, %251 : vector<8x32xf32>
    %253 = vector.broadcast %160 : vector<1x32xf32> to vector<8x32xf32>
    %254 = arith.mulf %252, %253 : vector<8x32xf32>
    %255 = vector.broadcast %162 : vector<1x32xf32> to vector<8x32xf32>
    %256 = arith.addf %254, %255 : vector<8x32xf32>
    %257 = arith.truncf %256 : vector<8x32xf32> to vector<8x32xbf16>
    %cst_98 = arith.constant dense<0.000000e+00> : vector<8x64xf32>
    %258 = tpu.matmul %257, %152, %cst_98 {dimension_numbers = #tpu.dot_dimension_numbers<[1], [0], [0], [1], [0, 0, 1, 1], [], []>} : vector<8x32xbf16>, vector<32x64xbf16>, vector<8x64xf32> -> vector<8x64xf32>
    %259 = vector.broadcast %164 : vector<1x64xf32> to vector<8x64xf32>
    %260 = arith.addf %258, %259 : vector<8x64xf32>
    %cst_99 = arith.constant 0.000000e+00 : f32
    %261 = vector.broadcast %cst_99 : f32 to vector<8x64xf32>
    %262 = arith.maximumf %260, %261 : vector<8x64xf32>
    %263 = arith.truncf %262 : vector<8x64xf32> to vector<8x64xbf16>
    %cst_100 = arith.constant dense<0.000000e+00> : vector<8x32xf32>
    %264 = tpu.matmul %263, %154, %cst_100 {dimension_numbers = #tpu.dot_dimension_numbers<[1], [0], [0], [1], [0, 0, 1, 1], [], []>} : vector<8x64xbf16>, vector<64x32xbf16>, vector<8x32xf32> -> vector<8x32xf32>
    %265 = vector.broadcast %166 : vector<1x32xf32> to vector<8x32xf32>
    %266 = arith.addf %264, %265 : vector<8x32xf32>
    %267 = arith.addf %256, %266 : vector<8x32xf32>
    %cst_101 = arith.constant dense<0.000000e+00> : vector<8xf32>
    %268 = vector.multi_reduction <add>, %267, %cst_101 [1] : vector<8x32xf32> to vector<8xf32>
    %269 = vector.shape_cast %268 : vector<8xf32> to vector<8x1xf32>
    %cst_102 = arith.constant 3.200000e+01 : f32
    %270 = vector.broadcast %cst_102 : f32 to vector<8x1xf32>
    %271 = arith.divf %269, %270 : vector<8x1xf32>
    %272 = vector.broadcast %271 : vector<8x1xf32> to vector<8x32xf32>
    %273 = arith.subf %267, %272 : vector<8x32xf32>
    %274 = arith.mulf %273, %273 : vector<8x32xf32>
    %cst_103 = arith.constant dense<0.000000e+00> : vector<8xf32>
    %275 = vector.multi_reduction <add>, %274, %cst_103 [1] : vector<8x32xf32> to vector<8xf32>
    %276 = vector.shape_cast %275 : vector<8xf32> to vector<8x1xf32>
    %cst_104 = arith.constant 3.200000e+01 : f32
    %277 = vector.broadcast %cst_104 : f32 to vector<8x1xf32>
    %278 = arith.divf %276, %277 : vector<8x1xf32>
    %279 = vector.broadcast %271 : vector<8x1xf32> to vector<8x32xf32>
    %280 = arith.subf %267, %279 : vector<8x32xf32>
    %cst_105 = arith.constant 9.99999974E-6 : f32
    %281 = vector.broadcast %cst_105 : f32 to vector<8x1xf32>
    %282 = arith.addf %278, %281 : vector<8x1xf32>
    %283 = math.rsqrt %282 : vector<8x1xf32>
    %284 = vector.broadcast %283 : vector<8x1xf32> to vector<8x32xf32>
    %285 = arith.mulf %280, %284 : vector<8x32xf32>
    %286 = vector.broadcast %168 : vector<1x32xf32> to vector<8x32xf32>
    %287 = arith.mulf %285, %286 : vector<8x32xf32>
    %288 = vector.broadcast %170 : vector<1x32xf32> to vector<8x32xf32>
    %289 = arith.addf %287, %288 : vector<8x32xf32>
    %c0_106 = arith.constant 0 : index
    %c0_107 = arith.constant 0 : index
    %c0_108 = arith.constant 0 : index
    %290 = vector.load %arg5[%c0_106, %c0_107, %c0_108] : memref<1x8x32xf32, #tpu.memory_space<vmem>>, vector<1x8x32xf32>
    %291 = vector.shape_cast %290 : vector<1x8x32xf32> to vector<8x32xf32>
    %292 = vector.shape_cast %289 : vector<8x32xf32> to vector<1x8x32xf32>
    tpu.vector_store %arg5[%c0_106, %c0_107, %c0_108], %292 {strides = array<i32>} : memref<1x8x32xf32, #tpu.memory_space<vmem>>, vector<1x8x32xf32>,
    return
  }
  func.func @transform_0(%arg0: i32) -> (i32, i32, i32) {
    %c0_i32 = arith.constant 0 : i32
    %c0_i32_0 = arith.constant 0 : i32
    %c0_i32_1 = arith.constant 0 : i32
    return %arg0, %c0_i32, %c0_i32_0 : i32, i32, i32
  }
  func.func @transform_1(%arg0: i32) -> (i32, i32, i32) {
    %c0_i32 = arith.constant 0 : i32
    %c0_i32_0 = arith.constant 0 : i32
    %c0_i32_1 = arith.constant 0 : i32
    return %arg0, %c0_i32, %c0_i32_0 : i32, i32, i32
  }
  func.func @transform_2(%arg0: i32) -> (i32, i32, i32) {
    %c0_i32 = arith.constant 0 : i32
    %c0_i32_0 = arith.constant 0 : i32
    %c0_i32_1 = arith.constant 0 : i32
    %c0_i32_2 = arith.constant 0 : i32
    return %c0_i32, %c0_i32_0, %c0_i32_1 : i32, i32, i32
  }
  func.func @transform_3(%arg0: i32) -> (i32, i32, i32) {
    %c0_i32 = arith.constant 0 : i32
    %c0_i32_0 = arith.constant 0 : i32
    %c0_i32_1 = arith.constant 0 : i32
    %c0_i32_2 = arith.constant 0 : i32
    return %c0_i32, %c0_i32_0, %c0_i32_1 : i32, i32, i32
  }
  func.func @transform_4(%arg0: i32) -> (i32, i32, i32) {
    %c0_i32 = arith.constant 0 : i32
    %c0_i32_0 = arith.constant 0 : i32
    %c0_i32_1 = arith.constant 0 : i32
    return %arg0, %c0_i32, %c0_i32_0 : i32, i32, i32
  }
}

</mosaic_0001>

<bundles_post_ra>
// kernel: tpu_custom_call.1
= control target key start
LH: loop header
LB: loop body
LE: loop exit
PB: predicated region body
PF: predicated region fallthrough
CT: control target
= control target key end

     0   :  { %9 = vsyncpa [#allocation3], 0  ;;  %s3100_s0 = inlined_call_operand.hbm [shape: f32[2,8,32], index: 0, kind: input, shape index: {}]   ;;  %s3101_s1 = inlined_call_operand.vmem [shape: f32[2,1,8], index: 1, kind: input, shape index: {}]   ;;  %s3102_s2 = inlined_call_operand.hbm [shape: bf16[2,160,96], index: 2, kind: input, shape index: {}]   ;;  %s3103_s3 = inlined_call_operand.hbm [shape: f32[2,8,96], index: 3, kind: input, shape index: {}]   ;;  %s3104_s4 = inlined_call_operand.hbm [shape: f32[2,8,32], index: 4, kind: output, shape index: {}]  }
   0x1   :  { %11 = vsyncpa [#allocation3 + $0x1], 0 }
   0x2   :  { %12 = vsyncpa [#allocation6], 0 }
   0x3   :  { %13 = vsyncpa [#allocation4], 0 }
   0x4   :  { %15 = vsyncpa [#allocation4 + $0x1], 0  ;;  %s2618_s15 = smov 0   ;;  %s2620_s16 = smov 0  }
   0x5   :  { %s2622_s17 = smov 0   ;;  %s2624_s18 = smov 0  }
   0x6 LB: > { %s2639_s19 = sadd.s32 4294967295, %s2573_s18   ;;  %s1971_s20 = sadd.s32 4294967294, %s2573_s18   ;;  %s2573_s18 = sphi %s2624_s18, %s3124_s18   ;;  %s2569_s17 = sphi %s2622_s17, %s3123_s17   ;;  %s2565_s16 = sphi %s2620_s16, %s3122_s16   ;;  %s2561_s15 = sphi %s2618_s15, %s3121_s15  }
   0x7   : > { %p41_p0 = scmp.ne.s32.totalorder %s2565_s16, %s2561_s15  ;;  %p3105_p1 = scmp.eq.s32.totalorder %s2639_s19, 0 }
   0x8   : > { %p139_p3 = scmp.eq.s32.totalorder %s1971_s20, 1  ;;  %p1972_p5 = scmp.ge.s32.totalorder %s2573_s18, 1 }
   0x9   : > { %p2648_p4 = por %p3105_p1, %p41_p0  ;;  %p146_p7 = scmp.lt.s32.totalorder %s2573_s18, 3 }
   0xa   : > { %p2653_p6 = por %p139_p3, %p41_p0  ;;  %s2575_s24 = smov [#allocation5]  }
   0xb   : > { %s3108_s21 = scalar_select %p2648_p4, 1, 0 }
   0xc   : > { %s3109_s22 = scalar_select %p2653_p6, 1, 0 }
   0xd   : > { %p2658_p8 = pnand %p1972_p5, %p146_p7  ;;  %s158_s25 = sshll.u32 %s2575_s24, 4  ;;  %s2662_s25 = int_to_ptr.vmem [resolvable:$true] %s158_s25 }
   0xe   : > { %s2576_s27 = smov [#allocation7]   ;;  %s2417_s5 = scalar_lea.hbm %s3102_s2, 2560 }
   0xf   : > { %p2288_p9 = pneg %p2658_p8  ;;  %s171_s28 = sshll.u32 %s2576_s27, 4  ;;  %s2673_s28 = int_to_ptr.vmem [resolvable:$true] %s171_s28 }
  0x10   : > { %p2418_p12 = scmp.ne.s32.totalorder %s3102_s2, %s2417_s5  ;;  %p2424_p5 = scmp.lt.u32.totalorder %s2417_s5, %s3102_s2 }
  0x11   : > { %p2669_p11 = pnand %p2288_p9, %p3105_p1 }
  0x13   : > { %p2419_p13 = pneg %p2669_p11 }
  0x15   : > { %p2420_p0 = pnand %p2419_p13, %p2418_p12 }
  0x17   : > { %p2421_p3 = pneg %p2420_p0 }
  0x19   : > { %p2426_p7 = pnand %p2424_p5, %p2421_p3 }
  0x1b   : > { %2429 = shalt.err (!%p2426_p7)
}
  0x1c   : > { %s2430_s10 = scalar_lea.vmem %s2662_s25, 2560  ;;  %p2438_p2 = scmp.lt.s32.totalorder %s2662_s25, %s2662_s25 }
  0x1d   : > { %p2431_p9 = scmp.ne.s32.totalorder %s2662_s25, %s2430_s10  ;;  %p2439_p12 = scmp.lt.s32.totalorder %s2430_s10, %s2430_s10 }
  0x1f   : > { %p2433_p10 = pnand %p2431_p9, %p2419_p13  ;;  %p2440_p0 = por %p2439_p12, %p2438_p2 }
  0x21   : > { %p2434_p1 = pneg %p2433_p10 }
  0x23   : > { %p2441_p6 = pnand %p2440_p0, %p2434_p1 }
  0x25   : > { %2444 = shalt.err (!%p2441_p6)
}
  0x26   : > { %s2577_s11 = smov 64   ;;  %s2578_s12 = smov 4  }
  0x27   : > { %2291 = dma.hbm_to_vmem [thread:$0]  (!%p2669_p11), %s3102_s2, 2560, %s2662_s25, [#allocation6], %s2577_s11, %s2577_s11, %s2578_s12  }
  0x28   : > { %s2445_s27 = scalar_lea.hbm %s3103_s3, 256 }
  0x29   : > { %p2446_p2 = scmp.ne.s32.totalorder %s3103_s3, %s2445_s27  ;;  %p2452_p10 = scmp.lt.u32.totalorder %s2445_s27, %s3103_s3 }
  0x2b   : > { %p2448_p1 = pnand %p2446_p2, %p2419_p13 }
  0x2d   : > { %p2449_p6 = pneg %p2448_p1 }
  0x2f   : > { %p2454_p3 = pnand %p2452_p10, %p2449_p6 }
  0x31   : > { %2457 = shalt.err (!%p2454_p3)
}
  0x32   : > { %s2458_s25 = scalar_lea.vmem %s2673_s28, 256  ;;  %p2466_p12 = scmp.lt.s32.totalorder %s2673_s28, %s2673_s28 }
  0x33   : > { %p2459_p5 = scmp.ne.s32.totalorder %s2673_s28, %s2458_s25  ;;  %p2467_p0 = scmp.lt.s32.totalorder %s2458_s25, %s2458_s25 }
  0x35   : > { %p2461_p7 = pnand %p2459_p5, %p2419_p13  ;;  %p2468_p2 = por %p2467_p0, %p2466_p12 }
  0x37   : > { %p2462_p9 = pneg %p2461_p7 }
  0x39   : > { %p2469_p1 = pnand %p2468_p2, %p2462_p9 }
  0x3b   : > { %2472 = shalt.err (!%p2469_p1)
}
  0x3c   : > { %s2579_s7 = smov 128   ;;  %s2580_s8 = smov 8  }
  0x3d   : > { %2294 = dma.hbm_to_vmem [thread:$0]  (!%p2669_p11), %s3103_s3, 256, %s2673_s28, [#allocation6], %s2579_s7, %s2579_s7, %s2580_s8  }
  0x3e   : > { %s2728_s11 = sadd.s32 1, %s2573_s18   ;;  %s28_s13 = sadd.s32 1, %s2569_s17 }
  0x3f   : > { %s25_s12 = ssub.s32 %s2573_s18, %s2728_s11  ;;  %p35_p6 = scmp.ne.s32.totalorder %s2569_s17, %s2565_s16 }
  0x40   : > { %p26_p13 = scmp.eq.s32.totalorder %s25_s12, 0  ;;  %p36_p10 = scmp.eq.s32.totalorder %s2573_s18, 0 }
  0x41   : > { %p3112_p5 = scmp.eq.s32.totalorder %s2639_s19, 1  ;;  %p2305_p9 = scmp.lt.s32.totalorder %s2573_s18, 2 }
  0x42   : > { %s2737_s14 = scalar_select %p26_p13, %s2569_s17, %s28_s13  }
  0x43   : > { %p37_p3 = por %p36_p10, %p35_p6  ;;  %p2741_p7 = por %p3112_p5, %p35_p6 }
  0x44   : > { %s185_s26 = sand.u32 1, %s2569_s17   ;;  %s1977_s28 = sshll.u32 %s2573_s18, 7 }
  0x45   : > { %s3113_s20 = scalar_select %p2741_p7, 1, 0 }
  0x46   : > { %s1976_s24 = sshll.u32 %s185_s26, 3  ;;  %s2751_s30 = scalar_lea.hbm %s3100_s0, %s1977_s28 }
  0x47   : > { %s189_s5 = scalar_lea.vmem [#allocation2], %s1976_s24  ;;  %p2755_p11 = pnand %p2305_p9, %p37_p3 }
  0x48   : > { %s196_s6 = sshll.u32 %s189_s5, 4  ;;  %s186_s7 = scalar_lea.sflag [#allocation3], %s185_s26  ;;  %s2753_s6 = int_to_ptr.vmem [resolvable:$true] %s196_s6 }
  0x49   : > { %s2473_s8 = scalar_lea.hbm %s2751_s30, 128  ;;  %p2475_p0 = pneg %p2755_p11 }
  0x4a   : > { %p2474_p12 = scmp.ne.s32.totalorder %s2751_s30, %s2473_s8  ;;  %s2478_s12 = scalar_lea.hbm %s3100_s0, 256 }
  0x4b   : > { %p2479_p13 = scmp.lt.u32.totalorder %s2751_s30, %s3100_s0  ;;  %p2480_p6 = scmp.lt.u32.totalorder %s2478_s12, %s2473_s8 }
  0x4c   : > { %p2476_p2 = pnand %p2475_p0, %p2474_p12  ;;  %p2482_p3 = scmp.lt.u32.totalorder %s2473_s8, %s2751_s30 }
  0x4d   : > { %p2481_p10 = por %p2480_p6, %p2479_p13 }
  0x4e   : > { %p2477_p1 = pneg %p2476_p2 }
  0x4f   : > { %p2483_p5 = por %p2482_p3, %p2481_p10 }
  0x51   : > { %p2484_p9 = pnand %p2483_p5, %p2477_p1 }
  0x53   : > { %2487 = shalt.err (!%p2484_p9)
}
  0x54   : > { %s2488_s26 = scalar_lea.vmem %s2753_s6, 128  ;;  %s2581_s28 = smov [#allocation2]  }
  0x55   : > { %p2489_p12 = scmp.ne.s32.totalorder %s2753_s6, %s2488_s26  ;;  %s2493_s27 = sshll.u32 %s2581_s28, 4  ;;  %s2494_s27 = int_to_ptr.vmem [resolvable:$false] %s2493_s27 }
  0x56   : > { %s2495_s29 = scalar_lea.vmem %s2494_s27, 256  ;;  %p2496_p4 = scmp.lt.s32.totalorder %s2753_s6, %s2494_s27 }
  0x57   : > { %p2491_p2 = pnand %p2489_p12, %p2475_p0  ;;  %p2497_p13 = scmp.lt.s32.totalorder %s2495_s29, %s2488_s26 }
  0x59   : > { %p2492_p7 = pneg %p2491_p2  ;;  %p2498_p6 = por %p2497_p13, %p2496_p4 }
  0x5b   : > { %p2499_p10 = pnand %p2498_p6, %p2492_p7 }
  0x5d   : > { %2502 = shalt.err (!%p2499_p10)
}
  0x5e   : > { %2298 = dma.hbm_to_vmem [thread:$0]  (!%p2755_p11), %s2751_s30, 128, %s2753_s6, %s186_s7  }
  0x5f   : > { %211 = sbr.rel (%p2658_p8) target bundleno = 5336 (0x14d8), region = 36  ;;  %s2787_s5 = sand.u32 (!%p2658_p8), 1, %s2565_s16  }
  0x60   : > { %s1979_s8 = sshll.u32 (!%p2658_p8), %s2787_s5, 3  ;;  %s214_s9 = scalar_lea.sflag (!%p2658_p8), [#allocation3], %s2787_s5 }
  0x61   : > { %s217_s10 = scalar_lea.vmem (!%p2658_p8), [#allocation2], %s1979_s8  ;;  %p3115_p4 = scmp.ne.s32.totalorder (!%p2658_p8), %s3108_s21, 0 }
  0x66   : > { %2548 = dma.done.wait (%p3115_p4), %s214_s9, 128  }
  0x67   : > { %2550 = vsyncadd (%p3115_p4), %s214_s9, 4294967168  ;;  %p3116_p7 = scmp.eq.s32.totalorder %s2639_s19, 0 }
  0x69   : > { %2552 = dma.done.wait (%p3116_p7), [#allocation6], 2816   ;;  %p3117_p8 = pmov %p3116_p7 }
  0x6a   : > { %v2582_v0 = vmov 0.0   ;;  %vm2583_vm0 = vmmov 0   ;;  %v2357_v1 = vld [vmem:[#allocation5] sm:$0xff]   ;;  %v2358_v2 = vld [vmem:[#allocation5 + $0x8] sm:$0xff]   ;;  %v2807_v3 = vld [vmem:[%s217_s10] sm:$0xff]  ;;  %vm304_vm1 = vcmask 261120  }
  0x6b   : > { %2554 = vsyncadd (%p3117_p8), [#allocation6], 4294964480  ;;  %2108 = vmatprep.subr.bf16.mxu1 %v2582_v0  ;;  %2112 = vmatprep.mubr.msk.bf16.mxu1 %vm2583_vm0, %v2582_v0  ;;  %v287_v4 = vpack.c.bf16 %v2807_v3, %v2807_v3  ;;  %v1983_v5 = vld [vmem:[#allocation7] ss:$0 sm:$0xff]  ;;  %s2584_s21 = smov 104   ;;  %s2585_s23 = smov 120  }
  0x6c   : > { %2122 = vmatprep.subr.bf16.mxu0 %v2582_v0  ;;  %2124 = vmatprep.mubr.msk.bf16.mxu0 %vm2583_vm0, %v2582_v0  ;;  %s2586_s30 = smov 96   ;;  %s2587_s6 = smov 112   ;;  %vm358_vm2 = vcmask 64512   ;;  %vm616_vm3 = vcmask 1043456   ;;  %vm817_vm4 = vcmask 130048   ;;  %vm819_vm5 = vcmask 195584  }
  0x6d   : > { %2109 = vmatpush3.bf16.msra.mxu1 %v2357_v1  ;;  %p253_p11 = scmp.lt.s32.totalorder %s2639_s19, 1  ;;  %s2588_s24 = smov 64   ;;  %vm996_vm6 = vcmask 523264  }
  0x6e   : > { %2110 = vmatprep.subr.bf16.mxu1 %v2582_v0  ;;  %s2589_s26 = smov 8   ;;  %s2590_s28 = smov 16  }
  0x6f   : > { %s254_s25 = scalar_select %p253_p11, %s2639_s19, 1 }
  0x70   : > { %s2591_s27 = smov 24   ;;  %s2045_s29 = sshll.u32 %s2639_s19, 7 }
  0x71   : > { %2111 = vmatpush3.bf16.msra.mxu1 %v2358_v2  ;;  %s255_s13 = scalar_lea.vmem %s3101_s1, %s254_s25  ;;  %s252_s9 = scalar_lea.vmem [#allocation8], %s1979_s8 }
  0x72   : > { %2116 = vmatprep.subr.bf16.mxu1 %v2582_v0  ;;  %v2867_v24 = vld [vmem:[%s255_s13] ss:$0 sm:$0xff]  ;;  %s1873_s10 = sshll.u32 %s252_s9, 4  ;;  %p3118_p1 = scmp.ne.s32.totalorder %s3113_s20, 0  ;;  %s3057_s10 = int_to_ptr.vmem [resolvable:$true] %s1873_s10 }
  0x73   : > { %s2503_s25 = scalar_lea.vmem %s3057_s10, 128  ;;  %s2592_s19 = smov [#allocation8]  }
  0x74   : > { %2113 = vmatmul.mubr.msk.bf16.vlgmr.msra.gmra.mrb[0].mxu1 %vm304_vm1, %v287_v4  ;;  %p2504_p0 = scmp.ne.s32.totalorder %s3057_s10, %s2503_s25  ;;  %s2507_s8 = sshll.u32 %s2592_s19, 4  ;;  %s2508_s8 = int_to_ptr.vmem [resolvable:$false] %s2507_s8 }
  0x75   : > { %2118 = vmatprep.mubr.msk.bf16.mxu1 %vm2583_vm0, %v2582_v0  ;;  %s2509_s7 = scalar_lea.vmem %s2508_s8, 256  ;;  %p2510_p9 = scmp.lt.s32.totalorder %s3057_s10, %s2508_s8 }
  0x76   : > { %p2505_p3 = pnand %p2504_p0, %p3118_p1  ;;  %p2511_p12 = scmp.lt.s32.totalorder %s2509_s7, %s2503_s25 }
  0x78   : > { %p2506_p5 = pneg %p2505_p3  ;;  %p2512_p2 = por %p2511_p12, %p2510_p9 }
  0x7a   : > { %p2513_p13 = pnand %p2512_p2, %p2506_p5 }
 0x147   : > { %v342_v6 = vpop.f32.mrb[0].mxu1 }
 0x148   : > { %v343_v7 = vadd.f32 %v1983_v5, %v342_v6  ;;  %v2114_v8 = vpop.f32.mrb[1].mxu1 }
 0x149   : > { %v345_v9 = vpop.f32.mrb[2].mxu1 }
 0x14a   : > { %v2816_v10 = vpack.c.bf16 %v343_v7, %v343_v7  ;;  %v2115_v11 = vpop.f32.mrb[3].mxu1 }
 0x14c   : > { %354 = vrot.lane.b32.xlu1 %v2816_v10, %s2584_s21  ;;  %350 = vrot.lane.b32.xlu0 %v2816_v10, %s2585_s23 }
 0x150   : > { %356 = vrot.lane.b32.xlu1 %v2816_v10, %s2586_s30  ;;  %352 = vrot.lane.b32.xlu0 %v2816_v10, %s2587_s6 }
 0x1be   : > { %v2826_v12 = vpop.permute.xlu1 %354  ;;  %v2828_v13 = vpop.permute.xlu0 %350 }
 0x1bf   : > { %405 = vrot.lane.b32.xlu0 %v2828_v13, %s2586_s30 }
 0x1c2   : > { %v357_v14 = vpop.permute.xlu1 %356  ;;  %v2832_v15 = vpop.permute.xlu0 %352 }
 0x1c3   : > { %v363_v16 = vsel %vm358_vm2, %v357_v14, 0  ;;  %501 = vrot.lane.b32.xlu0 %v2826_v12, %s2586_s30  ;;  %453 = vrot.lane.b32.xlu1 %v2832_v15, %s2586_s30 }
 0x1c4   : > { %2117 = vmatpush3.bf16.xpose.msra.mxu1 %v363_v16 }
 0x1c5   : > { %2128 = vmatprep.subr.bf16.mxu1 %v2582_v0 }
 0x1cb   : > { %2119 = vmatmul.mubr.msk.bf16.vlgmr.msra.gmra.mrb[4].mxu1 %vm358_vm2, %v2816_v10 }
 0x1cc   : > { %2130 = vmatprep.mubr.msk.bf16.mxu1 %vm2583_vm0, %v2582_v0 }
 0x231   : > { %v406_v17 = vpop.permute.xlu0 %405 }
 0x232   : > { %v411_v18 = vsel %vm358_vm2, %v406_v17, 0 }
 0x233   : > { %2123 = vmatpush3.bf16.xpose.msra.mxu0 %v411_v18 }
 0x234   : > { %2134 = vmatprep.subr.bf16.mxu0 %v2582_v0 }
 0x235   : > { %v454_v19 = vpop.permute.xlu1 %453  ;;  %v502_v21 = vpop.permute.xlu0 %501 }
 0x236   : > { %v459_v20 = vsel %vm358_vm2, %v454_v19, 0  ;;  %v507_v22 = vsel %vm358_vm2, %v502_v21, 0 }
 0x237   : > { %2129 = vmatpush3.bf16.xpose.msra.mxu1 %v459_v20 }
 0x238   : > { %2140 = vmatprep.subr.bf16.mxu1 %v2582_v0 }
 0x23a   : > { %2125 = vmatmul.mubr.msk.bf16.vlgmr.msra.gmra.mrb[0].mxu0 %vm358_vm2, %v2828_v13 }
 0x23b   : > { %2135 = vmatpush3.bf16.xpose.msra.mxu0 %v507_v22  ;;  %2136 = vmatprep.mubr.msk.bf16.mxu0 %vm2583_vm0, %v2582_v0 }
 0x23c   : > { %2146 = vmatprep.subr.bf16.mxu0 %v2582_v0 }
 0x23e   : > { %2131 = vmatmul.mubr.msk.bf16.vlgmr.msra.gmra.mrb[8].mxu1 %vm358_vm2, %v2832_v15 }
 0x23f   : > { %2142 = vmatprep.mubr.msk.bf16.mxu1 %vm2583_vm0, %v2582_v0 }
 0x242   : > { %2137 = vmatmul.mubr.msk.bf16.vlgmr.msra.gmra.mrb[4].mxu0 %vm358_vm2, %v2826_v12 }
 0x243   : > { %2148 = vmatprep.mubr.msk.bf16.mxu0 %vm2583_vm0, %v2582_v0 }
 0x29e   : > { %v399_v23 = vpop.f32.mrb[4].mxu1 }
 0x29f   : > { %v549_v25 = vmul.f32 0.35355338, %v399_v23  ;;  %v2120_v26 = vpop.f32.mrb[5].mxu1 }
 0x2a0   : > { %v402_v27 = vpop.f32.mrb[6].mxu1 }
 0x2a1   : > { %v2121_v28 = vpop.f32.mrb[7].mxu1  ;;  %v559_v29 = vadd.f32 %v2867_v24, %v549_v25 }
 0x2a3   : > { %v563_v30 = vsel %vm358_vm2, %v559_v29, -inf }
 0x2a4   : > { %564 = vmax.xlane.f32.xlu1 %v563_v30 }
 0x30d   : > { %v447_v31 = vpop.f32.mrb[0].mxu0 }
 0x30e   : > { %v550_v32 = vmul.f32 0.35355338, %v447_v31  ;;  %v2126_v33 = vpop.f32.mrb[1].mxu0 }
 0x30f   : > { %v450_v34 = vpop.f32.mrb[2].mxu0 }
 0x310   : > { %v2127_v35 = vpop.f32.mrb[3].mxu0  ;;  %v560_v36 = vadd.f32 %v2867_v24, %v550_v32 }
 0x311   : > { %v495_v37 = vpop.f32.mrb[8].mxu1 }
 0x312   : > { %v551_v38 = vmul.f32 0.35355338, %v495_v37  ;;  %v2132_v39 = vpop.f32.mrb[9].mxu1  ;;  %v566_v40 = vsel %vm358_vm2, %v560_v36, -inf }
 0x313   : > { %567 = vmax.xlane.f32.xlu0 %v566_v40  ;;  %v498_v41 = vpop.f32.mrb[10].mxu1  ;;  %v2359_v39 = vld [vmem:[#allocation5 + $0x10] sm:$0xff]   ;;  %v2360_v40 = vld [vmem:[#allocation5 + $0x18] sm:$0xff]  }
 0x314   : > { %v2133_v42 = vpop.f32.mrb[11].mxu1  ;;  %v561_v43 = vadd.f32 %v2867_v24, %v551_v38 }
 0x315   : > { %v543_v44 = vpop.f32.mrb[4].mxu0 }
 0x316   : > { %v552_v45 = vmul.f32 0.35355338, %v543_v44  ;;  %v2138_v46 = vpop.f32.mrb[5].mxu0  ;;  %v569_v47 = vsel %vm358_vm2, %v561_v43, -inf }
 0x317   : > { %v546_v48 = vpop.f32.mrb[6].mxu0  ;;  %570 = vmax.xlane.f32.xlu0 %v569_v47 }
 0x318   : > { %v2139_v49 = vpop.f32.mrb[7].mxu0  ;;  %v562_v50 = vadd.f32 %v2867_v24, %v552_v45 }
 0x31a   : > { %v572_v51 = vsel %vm358_vm2, %v562_v50, -inf }
 0x31b   : > { %573 = vmax.xlane.f32.xlu1 %v572_v51 }
 0x32c   : > { %660 = vrot.lane.b32.xlu1 %v2828_v13, %s2588_s24 }
 0x32d   : > { %611 = vrot.lane.b32.xlu0 %v2816_v10, %s2588_s24 }
 0x331   : > { %v565_v52 = vpop.xlane.xlu1 %564 }
 0x332   : > { %v575_v53 = vsub.f32 %v559_v29, %v565_v52 }
 0x334   : > { %v579_v54 = vmul.f32 1.442695, %v575_v53 }
 0x336   : > { %2377 = vpow2.f32 %v579_v54 }
 0x340   : > { %v2378_v55 = vpop.eup %2377 }
 0x341   : > { %v587_v56 = vsel %vm358_vm2, %v2378_v55, 0.0 }
 0x34c   : > { %588 = vadd.xlane.f32.xlu0 %v587_v56 }
 0x3a0   : > { %v568_v57 = vpop.xlane.xlu0 %567 }
 0x3a1   : > { %v576_v58 = vsub.f32 %v560_v36, %v568_v57 }
 0x3a3   : > { %v581_v59 = vmul.f32 1.442695, %v576_v58 }
 0x3a4   : > { %v571_v60 = vpop.xlane.xlu0 %570 }
 0x3a5   : > { %2379 = vpow2.f32 %v581_v59  ;;  %v577_v61 = vsub.f32 %v561_v43, %v571_v60  ;;  %v1996_v60 = vld [vmem:[#allocation7 + $0x1] ss:$0 sm:$0xff] }
 0x3a7   : > { %v583_v62 = vmul.f32 1.442695, %v577_v61 }
 0x3a8   : > { %v574_v63 = vpop.xlane.xlu1 %573  ;;  %v612_v1 = vpop.permute.xlu0 %611 }
 0x3a9   : > { %2381 = vpow2.f32 %v583_v62  ;;  %v578_v2 = vsub.f32 %v562_v50, %v574_v63  ;;  %v618_v4 = vsel %vm616_vm3, %v612_v1, 0 }
 0x3aa   : > { %2141 = vmatpush3.bf16.msra.mxu1 %v618_v4 }
 0x3ab   : > { %v585_v5 = vmul.f32 1.442695, %v578_v2  ;;  %2152 = vmatprep.subr.bf16.mxu1 %v2582_v0 }
 0x3ac   : > { %v661_v6 = vpop.permute.xlu1 %660 }
 0x3ad   : > { %2383 = vpow2.f32 %v585_v5  ;;  %v666_v7 = vsel %vm616_vm3, %v661_v6, 0 }
 0x3ae   : > { %2147 = vmatpush3.bf16.msra.mxu0 %v666_v7 }
 0x3af   : > { %v2380_v8 = vpop.eup %2379  ;;  %2158 = vmatprep.subr.bf16.mxu0 %v2582_v0 }
 0x3b0   : > { %v590_v9 = vsel %vm358_vm2, %v2380_v8, 0.0 }
 0x3b1   : > { %591 = vadd.xlane.f32.xlu1 %v590_v9 }
 0x3b3   : > { %v2382_v10 = vpop.eup %2381 }
 0x3b4   : > { %v593_v11 = vsel %vm358_vm2, %v2382_v10, 0.0 }
 0x3b5   : > { %594 = vadd.xlane.f32.xlu0 %v593_v11  ;;  %v2361_v11 = vld [vmem:[#allocation5 + $0x20] sm:$0xff]  }
 0x3b7   : > { %v2384_v13 = vpop.eup %2383 }
 0x3b8   : > { %v596_v14 = vsel %vm358_vm2, %v2384_v13, 0.0 }
 0x3b9   : > { %597 = vadd.xlane.f32.xlu1 %v596_v14  ;;  %v2363_v14 = vld [vmem:[#allocation5 + $0x30] sm:$0xff]  }
 0x3ca   : > { %708 = vrot.lane.b32.xlu1 %v2832_v15, %s2588_s24 }
 0x3cb   : > { %756 = vrot.lane.b32.xlu0 %v2826_v12, %s2588_s24 }
 0x3d9   : > { %v589_v16 = vpop.xlane.xlu0 %588 }
 0x3da   : > { %2385 = vrcp.f32 %v589_v16 }
 0x3e4   : > { %v2386_v17 = vpop.eup %2385 }
 0x3e5   : > { %v603_v18 = vmul.f32 %v2386_v17, %v2378_v55 }
 0x3e7   : > { %v607_v19 = vpack.c.bf16 %v603_v18, %v603_v18 }
 0x3e9   : > { %2143 = vmatmul.mubr.msk.bf16.vlgmr.msra.gmra.mrb[12].mxu1 %vm358_vm2, %v607_v19 }
 0x3ea   : > { %2154 = vmatprep.mubr.msk.bf16.mxu1 %vm2583_vm0, %v2582_v0 }
 0x43e   : > { %v592_v20 = vpop.xlane.xlu1 %591 }
 0x43f   : > { %2387 = vrcp.f32 %v592_v20  ;;  %v2000_v20 = vld [vmem:[#allocation7 + $0x2] ss:$0 sm:$0xff] }
 0x442   : > { %v595_v21 = vpop.xlane.xlu0 %594 }
 0x443   : > { %2389 = vrcp.f32 %v595_v21 }
 0x446   : > { %v598_v22 = vpop.xlane.xlu1 %597  ;;  %v757_v12 = vpop.permute.xlu0 %756 }
 0x447   : > { %2391 = vrcp.f32 %v598_v22  ;;  %v762_v30 = vsel %vm616_vm3, %v757_v12, 0  ;;  %v2001_v22 = vld [vmem:[#allocation7 + $0x3] ss:$0 sm:$0xff] }
 0x448   : > { %v2365_v12 = vld [vmem:[#allocation5 + $0x40] sm:$0xff]  }
 0x449   : > { %v2388_v15 = vpop.eup %2387 }
 0x44a   : > { %v604_v23 = vmul.f32 %v2388_v15, %v2380_v8  ;;  %v709_v25 = vpop.permute.xlu1 %708 }
 0x44b   : > { %v714_v26 = vsel %vm616_vm3, %v709_v25, 0 }
 0x44c   : > { %2153 = vmatpush3.bf16.msra.mxu1 %v714_v26  ;;  %v608_v27 = vpack.c.bf16 %v604_v23, %v604_v23  ;;  %v2366_v26 = vld [vmem:[#allocation5 + $0x48] sm:$0xff]  }
 0x44d   : > { %v2390_v28 = vpop.eup %2389  ;;  %2164 = vmatprep.subr.bf16.mxu1 %v2582_v0 }
 0x44e   : > { %v605_v29 = vmul.f32 %v2390_v28, %v2382_v10  ;;  %2149 = vmatmul.mubr.msk.bf16.vlgmr.msra.gmra.mrb[8].mxu0 %vm358_vm2, %v608_v27  ;;  %v2002_v27 = vld [vmem:[#allocation7 + $0x4] ss:$0 sm:$0xff] }
 0x44f   : > { %2159 = vmatpush3.bf16.msra.mxu0 %v762_v30  ;;  %2160 = vmatprep.mubr.msk.bf16.mxu0 %vm2583_vm0, %v2582_v0 }
 0x450   : > { %v609_v31 = vpack.c.bf16 %v605_v29, %v605_v29  ;;  %2172 = vmatprep.subr.bf16.mxu0 %v2582_v0 }
 0x451   : > { %v2392_v32 = vpop.eup %2391 }
 0x452   : > { %v606_v33 = vmul.f32 %v2392_v32, %v2384_v13  ;;  %2155 = vmatmul.mubr.msk.bf16.vlgmr.msra.gmra.mrb[16].mxu1 %vm358_vm2, %v609_v31  ;;  %v2362_v13 = vld [vmem:[#allocation5 + $0x28] sm:$0xff]  }
 0x453   : > { %2168 = vmatprep.mubr.msk.bf16.mxu1 %vm2583_vm0, %v2582_v0  ;;  %2165 = vmatpush3.bf16.msra.mxu1 %v2359_v39 }
 0x454   : > { %v610_v34 = vpack.c.bf16 %v606_v33, %v606_v33  ;;  %2166 = vmatprep.subr.bf16.mxu1 %v2582_v0 }
 0x456   : > { %2161 = vmatmul.mubr.msk.bf16.vlgmr.msra.gmra.mrb[12].mxu0 %vm358_vm2, %v610_v34 }
 0x457   : > { %2176 = vmatprep.mubr.msk.bf16.mxu0 %vm2583_vm0, %v2582_v0  ;;  %2167 = vmatpush3.bf16.msra.mxu1 %v2360_v40 }
 0x458   : > { %2180 = vmatprep.subr.bf16.mxu1 %v2582_v0  ;;  %2173 = vmatpush3.bf16.msra.mxu0 %v2361_v11 }
 0x459   : > { %2174 = vmatprep.subr.bf16.mxu0 %v2582_v0 }
 0x45c   : > { %2175 = vmatpush3.bf16.msra.mxu0 %v2362_v13 }
 0x45d   : > { %2192 = vmatprep.subr.bf16.mxu0 %v2582_v0 }
 0x4bc   : > { %v654_v35 = vpop.f32.mrb[12].mxu1 }
 0x4bd   : > { %v2144_v36 = vpop.f32.mrb[13].mxu1 }
 0x4be   : > { %v657_v37 = vpop.f32.mrb[14].mxu1 }
 0x4bf   : > { %v2145_v38 = vpop.f32.mrb[15].mxu1 }
 0x521   : > { %v702_v41 = vpop.f32.mrb[8].mxu0 }
 0x522   : > { %805 = vrot.lane.b32.xlu1 %v702_v41, %s2589_s26  ;;  %v2150_v42 = vpop.f32.mrb[9].mxu0 }
 0x523   : > { %v705_v43 = vpop.f32.mrb[10].mxu0 }
 0x524   : > { %v2151_v44 = vpop.f32.mrb[11].mxu0 }
 0x525   : > { %v750_v45 = vpop.f32.mrb[16].mxu1 }
 0x526   : > { %809 = vrot.lane.b32.xlu0 %v750_v45, %s2590_s28  ;;  %v2156_v46 = vpop.f32.mrb[17].mxu1 }
 0x527   : > { %v753_v47 = vpop.f32.mrb[18].mxu1 }
 0x528   : > { %v2157_v48 = vpop.f32.mrb[19].mxu1 }
 0x529   : > { %v798_v49 = vpop.f32.mrb[12].mxu0  ;;  %v2367_v48 = vld [vmem:[#allocation5 + $0x50] sm:$0xff]  }
 0x52a   : > { %813 = vrot.lane.b32.xlu1 %v798_v49, %s2591_s27  ;;  %v2162_v50 = vpop.f32.mrb[13].mxu0  ;;  %v2368_v49 = vld [vmem:[#allocation5 + $0x58] sm:$0xff]  }
 0x52b   : > { %v801_v51 = vpop.f32.mrb[14].mxu0 }
 0x52c   : > { %v2163_v52 = vpop.f32.mrb[15].mxu0 }
 0x594   : > { %v806_v53 = vpop.permute.xlu1 %805 }
 0x595   : > { %v816_v55 = vsel %vm358_vm2, %v654_v35, %v806_v53  ;;  %v2006_v35 = vld [vmem:[#allocation7 + $0x5] ss:$0 sm:$0xff] }
 0x598   : > { %v810_v54 = vpop.permute.xlu0 %809 }
 0x599   : > { %v818_v56 = vsel %vm817_vm4, %v816_v55, %v810_v54  ;;  %v2012_v54 = vld [vmem:[#allocation7 + $0x6] ss:$0 sm:$0xff] }
 0x59c   : > { %v814_v57 = vpop.permute.xlu1 %813 }
 0x59d   : > { %v820_v58 = vsel %vm819_vm5, %v818_v56, %v814_v57  ;;  %v2013_v56 = vld [vmem:[#allocation7 + $0x7] ss:$0 sm:$0xff] }
 0x59e   : > { %v821_v59 = vpack.c.bf16 %v820_v58, %v820_v58 }
 0x5a0   : > { %2169 = vmatmul.mubr.msk.bf16.vlgmr.msra.gmra.mrb[20].mxu1 %vm304_vm1, %v821_v59 }
 0x5a1   : > { %2188 = vmatprep.mubr.msk.bf16.mxu1 %vm2583_vm0, %v2582_v0  ;;  %2181 = vmatpush3.bf16.msra.mxu1 %v2363_v14 }
 0x5a2   : > { %2182 = vmatprep.subr.bf16.mxu1 %v2582_v0 }
 0x673   : > { %v875_v61 = vpop.f32.mrb[20].mxu1 }
 0x674   : > { %v876_v62 = vadd.f32 %v1996_v60, %v875_v61  ;;  %v2170_v63 = vpop.f32.mrb[21].mxu1  ;;  %v2014_v60 = vld [vmem:[#allocation7 + $0x8] ss:$0 sm:$0xff] }
 0x675   : > { %v878_v1 = vpop.f32.mrb[22].mxu1 }
 0x676   : > { %v2171_v2 = vpop.f32.mrb[23].mxu1  ;;  %v881_v4 = vadd.f32 %v876_v62, %v2807_v3  ;;  %v2364_v3 = vld [vmem:[#allocation5 + $0x38] sm:$0xff]  }
 0x677   : > { %2183 = vmatpush3.bf16.msra.mxu1 %v2364_v3 }
 0x678   : > { %v882_v5 = vsel %vm304_vm1, %v881_v4, 0.0  ;;  %2184 = vmatprep.subr.bf16.mxu1 %v2582_v0 }
 0x679   : > { %883 = vadd.xlane.f32.xlu0 %v882_v5 }
 0x67b   : > { %2185 = vmatpush3.bf16.msra.mxu1 %v2365_v12 }
 0x67c   : > { %2186 = vmatprep.subr.bf16.mxu1 %v2582_v0 }
 0x67f   : > { %2187 = vmatpush3.bf16.msra.mxu1 %v2366_v26 }
 0x680   : > { %2206 = vmatprep.subr.bf16.mxu1 %v2582_v0 }
 0x706   : > { %v884_v6 = vpop.xlane.xlu0 %883 }
 0x707   : > { %v886_v7 = vmul.f32 0.03125, %v884_v6 }
 0x709   : > { %v887_v8 = vsub.f32 %v881_v4, %v886_v7 }
 0x70b   : > { %v888_v9 = vmul.f32 %v887_v8, %v887_v8 }
 0x70d   : > { %v889_v10 = vsel %vm304_vm1, %v888_v9, 0.0 }
 0x70e   : > { %890 = vadd.xlane.f32.xlu1 %v889_v10 }
 0x79b   : > { %v891_v16 = vpop.xlane.xlu1 %890 }
 0x79c   : > { %v892_v17 = vmul.f32 0.03125, %v891_v16 }
 0x79e   : > { %v893_v18 = vadd.f32 1e-05, %v892_v17 }
 0x7a0   : > { %2393 = vrsqrt.f32 %v893_v18 }
 0x7aa   : > { %v2394_v19 = vpop.eup %2393 }
 0x7ab   : > { %v895_v21 = vmul.f32 %v2394_v19, %v887_v8 }
 0x7ad   : > { %v900_v15 = vmul.f32 %v2000_v20, %v895_v21 }
 0x7af   : > { %v905_v23 = vadd.f32 %v2001_v22, %v900_v15 }
 0x7b1   : > { %v906_v25 = vpack.c.bf16 %v905_v23, %v905_v23 }
 0x7b3   : > { %2177 = vmatmul.mubr.msk.bf16.vlgmr.msra.gmra.mrb[16].mxu0 %vm304_vm1, %v906_v25 }
 0x7b4   : > { %2196 = vmatprep.mubr.msk.bf16.mxu0 %vm2583_vm0, %v2582_v0  ;;  %2193 = vmatpush3.bf16.msra.mxu0 %v2367_v48 }
 0x7b5   : > { %2194 = vmatprep.subr.bf16.mxu0 %v2582_v0 }
 0x7b8   : > { %2195 = vmatpush3.bf16.msra.mxu0 %v2368_v49 }
 0x7b9   : > { %2200 = vmatprep.subr.bf16.mxu0 %v2582_v0 }
 0x886   : > { %v960_v28 = vpop.f32.mrb[16].mxu0 }
 0x887   : > { %v961_v29 = vadd.f32 %v2002_v27, %v960_v28  ;;  %v2178_v30 = vpop.f32.mrb[17].mxu0 }
 0x888   : > { %v963_v31 = vpop.f32.mrb[18].mxu0 }
 0x889   : > { %v966_v32 = vmax.f32 %v961_v29, 0.0  ;;  %v2179_v33 = vpop.f32.mrb[19].mxu0 }
 0x88b   : > { %v967_v34 = vpack.c.bf16 %v966_v32, %v966_v32 }
 0x88d   : > { %2189 = vmatmul.mubr.msk.bf16.vlgmr.msra.gmra.mrb[24].mxu1 %vm996_vm6, %v967_v34 }
 0x88e   : > { %2208 = vmatprep.mubr.msk.bf16.mxu1 %vm2583_vm0, %v2582_v0 }
 0x960   : > { %v1034_v36 = vpop.f32.mrb[24].mxu1 }
 0x961   : > { %v1035_v37 = vadd.f32 %v2006_v35, %v1034_v36  ;;  %v2190_v38 = vpop.f32.mrb[25].mxu1 }
 0x962   : > { %v1037_v39 = vpop.f32.mrb[26].mxu1 }
 0x963   : > { %v2191_v40 = vpop.f32.mrb[27].mxu1  ;;  %v1040_v41 = vadd.f32 %v1035_v37, %v905_v23 }
 0x965   : > { %v1041_v42 = vsel %vm304_vm1, %v1040_v41, 0.0 }
 0x966   : > { %1042 = vadd.xlane.f32.xlu0 %v1041_v42 }
 0x9f3   : > { %v1043_v43 = vpop.xlane.xlu0 %1042 }
 0x9f4   : > { %v1044_v44 = vmul.f32 0.03125, %v1043_v43 }
 0x9f6   : > { %v1045_v45 = vsub.f32 %v1040_v41, %v1044_v44 }
 0x9f8   : > { %v1046_v46 = vmul.f32 %v1045_v45, %v1045_v45 }
 0x9fa   : > { %v1047_v47 = vsel %vm304_vm1, %v1046_v46, 0.0 }
 0x9fb   : > { %1048 = vadd.xlane.f32.xlu0 %v1047_v47 }
 0xa88   : > { %v1049_v50 = vpop.xlane.xlu0 %1048 }
 0xa89   : > { %v1050_v51 = vmul.f32 0.03125, %v1049_v50 }
 0xa8b   : > { %v1051_v52 = vadd.f32 1e-05, %v1050_v51 }
 0xa8d   : > { %2395 = vrsqrt.f32 %v1051_v52 }
 0xa97   : > { %v2396_v53 = vpop.eup %2395 }
 0xa98   : > { %v1053_v55 = vmul.f32 %v2396_v53, %v1045_v45 }
 0xa9a   : > { %v1058_v57 = vmul.f32 %v2012_v54, %v1053_v55 }
 0xa9c   : > { %v2939_v58 = vadd.f32 %v2013_v56, %v1058_v57 }
 0xa9e   : > { %v1094_v59 = vpack.c.bf16 %v2939_v58, %v2939_v58 }
 0xaa0   : > { %2197 = vmatmul.mubr.msk.bf16.vlgmr.msra.gmra.mrb[20].mxu0 %vm304_vm1, %v1094_v59 }
 0xaa1   : > { %2202 = vmatprep.mubr.msk.bf16.mxu0 %vm2583_vm0, %v2582_v0 }
 0xb73   : > { %v1148_v61 = vpop.f32.mrb[20].mxu0 }
 0xb74   : > { %v1149_v62 = vadd.f32 %v2014_v60, %v1148_v61  ;;  %v2198_v63 = vpop.f32.mrb[21].mxu0 }
 0xb75   : > { %v1151_v1 = vpop.f32.mrb[22].mxu0 }
 0xb76   : > { %v2946_v2 = vpack.c.bf16 %v1149_v62, %v1149_v62  ;;  %v2199_v4 = vpop.f32.mrb[23].mxu0 }
 0xb78   : > { %1158 = vrot.lane.b32.xlu0 %v2946_v2, %s2587_s6  ;;  %1156 = vrot.lane.b32.xlu1 %v2946_v2, %s2585_s23  ;;  %s1860_s6 = scalar_lea.sflag [#allocation4], %s2787_s5 }
 0xb7c   : > { %1160 = vrot.lane.b32.xlu1 %v2946_v2, %s2584_s21 }
 0xb80   : > { %1162 = vrot.lane.b32.xlu1 %v2946_v2, %s2586_s30 }
 0xbea   : > { %v2956_v5 = vpop.permute.xlu0 %1158  ;;  %v1157_v6 = vpop.permute.xlu1 %1156 }
 0xbeb   : > { %1258 = vrot.lane.b32.xlu1 %v2956_v5, %s2586_s30  ;;  %1210 = vrot.lane.b32.xlu0 %v1157_v6, %s2586_s30 }
 0xbee   : > { %v2961_v7 = vpop.permute.xlu1 %1160 }
 0xbef   : > { %1306 = vrot.lane.b32.xlu0 %v2961_v7, %s2586_s30  ;;  %s3055_s30 = scalar_lea.hbm %s3104_s4, %s2045_s29 }
 0xbf2   : > { %v1163_v8 = vpop.permute.xlu1 %1162 }
 0xbf3   : > { %v1168_v9 = vsel %vm358_vm2, %v1163_v8, 0 }
 0xbf4   : > { %2201 = vmatpush3.bf16.xpose.msra.mxu0 %v1168_v9 }
 0xbf5   : > { %2212 = vmatprep.subr.bf16.mxu0 %v2582_v0 }
 0xbfb   : > { %2203 = vmatmul.mubr.msk.bf16.vlgmr.msra.gmra.mrb[24].mxu0 %vm358_vm2, %v2946_v2 }
 0xbfc   : > { %2214 = vmatprep.mubr.msk.bf16.mxu0 %vm2583_vm0, %v2582_v0 }
 0xc5d   : > { %v1211_v10 = vpop.permute.xlu0 %1210  ;;  %v1259_v11 = vpop.permute.xlu1 %1258 }
 0xc5e   : > { %v1216_v13 = vsel %vm358_vm2, %v1211_v10, 0  ;;  %v1264_v14 = vsel %vm358_vm2, %v1259_v11, 0 }
 0xc5f   : > { %2207 = vmatpush3.bf16.xpose.msra.mxu1 %v1216_v13  ;;  %2213 = vmatpush3.bf16.xpose.msra.mxu0 %v1264_v14 }
 0xc60   : > { %2218 = vmatprep.subr.bf16.mxu1 %v2582_v0  ;;  %2224 = vmatprep.subr.bf16.mxu0 %v2582_v0 }
 0xc61   : > { %v1307_v3 = vpop.permute.xlu0 %1306 }
 0xc62   : > { %v1312_v16 = vsel %vm358_vm2, %v1307_v3, 0 }
 0xc66   : > { %2209 = vmatmul.mubr.msk.bf16.vlgmr.msra.gmra.mrb[28].mxu1 %vm358_vm2, %v1157_v6  ;;  %2215 = vmatmul.mubr.msk.bf16.vlgmr.msra.gmra.mrb[28].mxu0 %vm358_vm2, %v2956_v5 }
 0xc67   : > { %2219 = vmatpush3.bf16.xpose.msra.mxu1 %v1312_v16  ;;  %2220 = vmatprep.mubr.msk.bf16.mxu1 %vm2583_vm0, %v2582_v0 }
 0xc68   : > { %2230 = vmatprep.subr.bf16.mxu1 %v2582_v0  ;;  %2226 = vmatprep.mubr.msk.bf16.mxu0 %vm2583_vm0, %v2582_v0 }
 0xc6e   : > { %2221 = vmatmul.mubr.msk.bf16.vlgmr.msra.gmra.mrb[32].mxu1 %vm358_vm2, %v2961_v7 }
 0xc6f   : > { %2232 = vmatprep.mubr.msk.bf16.mxu1 %vm2583_vm0, %v2582_v0 }
 0xcce   : > { %v1204_v17 = vpop.f32.mrb[24].mxu0 }
 0xccf   : > { %v1354_v18 = vmul.f32 0.35355338, %v1204_v17  ;;  %v2204_v19 = vpop.f32.mrb[25].mxu0 }
 0xcd0   : > { %v1207_v20 = vpop.f32.mrb[26].mxu0 }
 0xcd1   : > { %v2205_v21 = vpop.f32.mrb[27].mxu0  ;;  %v1358_v22 = vadd.f32 %v2867_v24, %v1354_v18 }
 0xcd3   : > { %v1362_v15 = vsel %vm358_vm2, %v1358_v22, -inf }
 0xcd4   : > { %1363 = vmax.xlane.f32.xlu1 %v1362_v15 }
 0xd39   : > { %v1252_v23 = vpop.f32.mrb[28].mxu1  ;;  %v1300_v25 = vpop.f32.mrb[28].mxu0 }
 0xd3a   : > { %v1355_v12 = vmul.f32 0.35355338, %v1252_v23  ;;  %v1356_v26 = vmul.f32 0.35355338, %v1300_v25  ;;  %v2210_v27 = vpop.f32.mrb[29].mxu1  ;;  %v2216_v28 = vpop.f32.mrb[29].mxu0 }
 0xd3b   : > { %v1255_v29 = vpop.f32.mrb[30].mxu1  ;;  %v1303_v30 = vpop.f32.mrb[30].mxu0 }
 0xd3c   : > { %v2211_v31 = vpop.f32.mrb[31].mxu1  ;;  %v2217_v32 = vpop.f32.mrb[31].mxu0  ;;  %v1359_v33 = vadd.f32 %v2867_v24, %v1355_v12  ;;  %v1360_v35 = vadd.f32 %v2867_v24, %v1356_v26  ;;  %v2369_v30 = vld [vmem:[#allocation5 + $0x60] sm:$0xff]  }
 0xd3d   : > { %v2370_v31 = vld [vmem:[#allocation5 + $0x68] sm:$0xff]  }
 0xd3e   : > { %v1365_v34 = vsel %vm358_vm2, %v1359_v33, -inf  ;;  %v1368_v39 = vsel %vm358_vm2, %v1360_v35, -inf }
 0xd3f   : > { %1366 = vmax.xlane.f32.xlu0 %v1365_v34 }
 0xd41   : > { %v1348_v36 = vpop.f32.mrb[32].mxu1 }
 0xd42   : > { %v1357_v37 = vmul.f32 0.35355338, %v1348_v36  ;;  %v2222_v38 = vpop.f32.mrb[33].mxu1 }
 0xd43   : > { %1369 = vmax.xlane.f32.xlu0 %v1368_v39  ;;  %v1351_v40 = vpop.f32.mrb[34].mxu1 }
 0xd44   : > { %v2223_v41 = vpop.f32.mrb[35].mxu1  ;;  %v1361_v42 = vadd.f32 %v2867_v24, %v1357_v37 }
 0xd46   : > { %v1371_v43 = vsel %vm358_vm2, %v1361_v42, -inf }
 0xd47   : > { %1372 = vmax.xlane.f32.xlu1 %v1371_v43 }
 0xd58   : > { %1458 = vrot.lane.b32.xlu1 %v1157_v6, %s2588_s24 }
 0xd59   : > { %1410 = vrot.lane.b32.xlu0 %v2946_v2, %s2588_s24 }
 0xd61   : > { %v1364_v44 = vpop.xlane.xlu1 %1363 }
 0xd62   : > { %v1374_v45 = vsub.f32 %v1358_v22, %v1364_v44 }
 0xd64   : > { %v1378_v46 = vmul.f32 1.442695, %v1374_v45 }
 0xd66   : > { %2397 = vpow2.f32 %v1378_v46 }
 0xd70   : > { %v2398_v47 = vpop.eup %2397 }
 0xd71   : > { %v1386_v48 = vsel %vm358_vm2, %v2398_v47, 0.0 }
 0xd78   : > { %1387 = vadd.xlane.f32.xlu0 %v1386_v48 }
 0xdcc   : > { %v1367_v49 = vpop.xlane.xlu0 %1366 }
 0xdcd   : > { %v1375_v50 = vsub.f32 %v1359_v33, %v1367_v49 }
 0xdcf   : > { %v1380_v51 = vmul.f32 1.442695, %v1375_v50 }
 0xdd0   : > { %v1370_v24 = vpop.xlane.xlu0 %1369 }
 0xdd1   : > { %2399 = vpow2.f32 %v1380_v51  ;;  %v1376_v52 = vsub.f32 %v1360_v35, %v1370_v24  ;;  %v2026_v51 = vld [vmem:[#allocation7 + $0x9] ss:$0 sm:$0xff] }
 0xdd3   : > { %v1382_v53 = vmul.f32 1.442695, %v1376_v52 }
 0xdd4   : > { %v1411_v54 = vpop.permute.xlu0 %1410  ;;  %v1373_v55 = vpop.xlane.xlu1 %1372 }
 0xdd5   : > { %2401 = vpow2.f32 %v1382_v53  ;;  %v1416_v56 = vsel %vm616_vm3, %v1411_v54, 0  ;;  %v1377_v57 = vsub.f32 %v1361_v42, %v1373_v55 }
 0xdd6   : > { %2225 = vmatpush3.bf16.msra.mxu0 %v1416_v56 }
 0xdd7   : > { %v1384_v59 = vmul.f32 1.442695, %v1377_v57  ;;  %2236 = vmatprep.subr.bf16.mxu0 %v2582_v0 }
 0xdd8   : > { %v1459_v60 = vpop.permute.xlu1 %1458 }
 0xdd9   : > { %2403 = vpow2.f32 %v1384_v59  ;;  %v1464_v61 = vsel %vm616_vm3, %v1459_v60, 0 }
 0xdda   : > { %2231 = vmatpush3.bf16.msra.mxu1 %v1464_v61 }
 0xddb   : > { %v2400_v62 = vpop.eup %2399  ;;  %2242 = vmatprep.subr.bf16.mxu1 %v2582_v0 }
 0xddc   : > { %v1389_v63 = vsel %vm358_vm2, %v2400_v62, 0.0 }
 0xddd   : > { %1390 = vadd.xlane.f32.xlu1 %v1389_v63 }
 0xddf   : > { %v2402_v1 = vpop.eup %2401 }
 0xde0   : > { %v1392_v2 = vsel %vm358_vm2, %v2402_v1, 0.0 }
 0xde1   : > { %1393 = vadd.xlane.f32.xlu0 %v1392_v2  ;;  %v2372_v2 = vld [vmem:[#allocation5 + $0x78] sm:$0xff]  }
 0xde3   : > { %v2404_v4 = vpop.eup %2403 }
 0xde4   : > { %v1395_v6 = vsel %vm358_vm2, %v2404_v4, 0.0 }
 0xde5   : > { %1396 = vadd.xlane.f32.xlu1 %v1395_v6  ;;  %v2374_v6 = vld [vmem:[#allocation5 + $0x88] sm:$0xff]  }
 0xdf6   : > { %1506 = vrot.lane.b32.xlu1 %v2956_v5, %s2588_s24 }
 0xdf7   : > { %1554 = vrot.lane.b32.xlu0 %v2961_v7, %s2588_s24 }
 0xe05   : > { %v1388_v8 = vpop.xlane.xlu0 %1387 }
 0xe06   : > { %2405 = vrcp.f32 %v1388_v8 }
 0xe10   : > { %v2406_v9 = vpop.eup %2405 }
 0xe11   : > { %v1402_v10 = vmul.f32 %v2406_v9, %v2398_v47 }
 0xe13   : > { %v1406_v11 = vpack.c.bf16 %v1402_v10, %v1402_v10 }
 0xe15   : > { %2227 = vmatmul.mubr.msk.bf16.vlgmr.msra.gmra.mrb[32].mxu0 %vm358_vm2, %v1406_v11  ;;  %v2030_v11 = vld [vmem:[#allocation7 + $0xa] ss:$0 sm:$0xff] }
 0xe16   : > { %2238 = vmatprep.mubr.msk.bf16.mxu0 %vm2583_vm0, %v2582_v0 }
 0xe6a   : > { %v1391_v13 = vpop.xlane.xlu1 %1390 }
 0xe6b   : > { %2407 = vrcp.f32 %v1391_v13 }
 0xe6e   : > { %v1394_v14 = vpop.xlane.xlu0 %1393 }
 0xe6f   : > { %2409 = vrcp.f32 %v1394_v14  ;;  %v2031_v14 = vld [vmem:[#allocation7 + $0xb] ss:$0 sm:$0xff] }
 0xe72   : > { %v1397_v3 = vpop.xlane.xlu1 %1396  ;;  %v1555_v7 = vpop.permute.xlu0 %1554 }
 0xe73   : > { %2411 = vrcp.f32 %v1397_v3  ;;  %v1560_v22 = vsel %vm616_vm3, %v1555_v7, 0  ;;  %v2376_v7 = vld [vmem:[#allocation5 + $0x98] sm:$0xff]  }
 0xe75   : > { %v2408_v5 = vpop.eup %2407 }
 0xe76   : > { %v1403_v16 = vmul.f32 %v2408_v5, %v2400_v62  ;;  %v1507_v17 = vpop.permute.xlu1 %1506 }
 0xe77   : > { %v1512_v18 = vsel %vm616_vm3, %v1507_v17, 0  ;;  %v2375_v17 = vld [vmem:[#allocation5 + $0x90] sm:$0xff]  }
 0xe78   : > { %2237 = vmatpush3.bf16.msra.mxu0 %v1512_v18  ;;  %v1407_v19 = vpack.c.bf16 %v1403_v16, %v1403_v16  ;;  %v2032_v18 = vld [vmem:[#allocation7 + $0xc] ss:$0 sm:$0xff] }
 0xe79   : > { %v2410_v20 = vpop.eup %2409  ;;  %2248 = vmatprep.subr.bf16.mxu0 %v2582_v0 }
 0xe7a   : > { %v1404_v21 = vmul.f32 %v2410_v20, %v2402_v1  ;;  %2233 = vmatmul.mubr.msk.bf16.vlgmr.msra.gmra.mrb[36].mxu1 %vm358_vm2, %v1407_v19  ;;  %v2371_v1 = vld [vmem:[#allocation5 + $0x70] sm:$0xff]  }
 0xe7b   : > { %2243 = vmatpush3.bf16.msra.mxu1 %v1560_v22  ;;  %2244 = vmatprep.mubr.msk.bf16.mxu1 %vm2583_vm0, %v2582_v0 }
 0xe7c   : > { %v1408_v15 = vpack.c.bf16 %v1404_v21, %v1404_v21  ;;  %2256 = vmatprep.subr.bf16.mxu1 %v2582_v0 }
 0xe7d   : > { %v2412_v23 = vpop.eup %2411 }
 0xe7e   : > { %v1405_v25 = vmul.f32 %v2412_v23, %v2404_v4  ;;  %2239 = vmatmul.mubr.msk.bf16.vlgmr.msra.gmra.mrb[36].mxu0 %vm358_vm2, %v1408_v15  ;;  %v2373_v4 = vld [vmem:[#allocation5 + $0x80] sm:$0xff]  }
 0xe7f   : > { %2252 = vmatprep.mubr.msk.bf16.mxu0 %vm2583_vm0, %v2582_v0  ;;  %2249 = vmatpush3.bf16.msra.mxu0 %v2369_v30 }
 0xe80   : > { %v1409_v12 = vpack.c.bf16 %v1405_v25, %v1405_v25  ;;  %2250 = vmatprep.subr.bf16.mxu0 %v2582_v0 }
 0xe82   : > { %2245 = vmatmul.mubr.msk.bf16.vlgmr.msra.gmra.mrb[40].mxu1 %vm358_vm2, %v1409_v12  ;;  %v2036_v12 = vld [vmem:[#allocation7 + $0xd] ss:$0 sm:$0xff] }
 0xe83   : > { %2260 = vmatprep.mubr.msk.bf16.mxu1 %vm2583_vm0, %v2582_v0  ;;  %2251 = vmatpush3.bf16.msra.mxu0 %v2370_v31 }
 0xe84   : > { %2264 = vmatprep.subr.bf16.mxu0 %v2582_v0  ;;  %2257 = vmatpush3.bf16.msra.mxu1 %v2371_v1 }
 0xe85   : > { %2258 = vmatprep.subr.bf16.mxu1 %v2582_v0 }
 0xe88   : > { %2259 = vmatpush3.bf16.msra.mxu1 %v2372_v2 }
 0xee8   : > { %v1452_v26 = vpop.f32.mrb[32].mxu0 }
 0xee9   : > { %v2228_v27 = vpop.f32.mrb[33].mxu0 }
 0xeea   : > { %v1455_v28 = vpop.f32.mrb[34].mxu0 }
 0xeeb   : > { %v2229_v29 = vpop.f32.mrb[35].mxu0 }
 0xf4d   : > { %v1500_v32 = vpop.f32.mrb[36].mxu1 }
 0xf4e   : > { %1603 = vrot.lane.b32.xlu1 %v1500_v32, %s2589_s26  ;;  %v2234_v33 = vpop.f32.mrb[37].mxu1 }
 0xf4f   : > { %v1503_v34 = vpop.f32.mrb[38].mxu1 }
 0xf50   : > { %v2235_v35 = vpop.f32.mrb[39].mxu1 }
 0xf51   : > { %v1548_v36 = vpop.f32.mrb[36].mxu0 }
 0xf52   : > { %1607 = vrot.lane.b32.xlu0 %v1548_v36, %s2590_s28  ;;  %v2240_v37 = vpop.f32.mrb[37].mxu0 }
 0xf53   : > { %v1551_v38 = vpop.f32.mrb[38].mxu0 }
 0xf54   : > { %v2241_v39 = vpop.f32.mrb[39].mxu0 }
 0xf55   : > { %v1596_v40 = vpop.f32.mrb[40].mxu1 }
 0xf56   : > { %1611 = vrot.lane.b32.xlu1 %v1596_v40, %s2591_s27  ;;  %v2246_v41 = vpop.f32.mrb[41].mxu1 }
 0xf57   : > { %v1599_v42 = vpop.f32.mrb[42].mxu1  ;;  %v2042_v41 = vld [vmem:[#allocation7 + $0xe] ss:$0 sm:$0xff] }
 0xf58   : > { %v2247_v43 = vpop.f32.mrb[43].mxu1 }
 0xf59   : > { %v2043_v43 = vld [vmem:[#allocation7 + $0xf] ss:$0 sm:$0xff] }
 0xfc0   : > { %v1604_v44 = vpop.permute.xlu1 %1603 }
 0xfc1   : > { %v1614_v46 = vsel %vm358_vm2, %v1452_v26, %v1604_v44 }
 0xfc4   : > { %v1608_v45 = vpop.permute.xlu0 %1607 }
 0xfc5   : > { %v1615_v47 = vsel %vm817_vm4, %v1614_v46, %v1608_v45 }
 0xfc8   : > { %v1612_v48 = vpop.permute.xlu1 %1611 }
 0xfc9   : > { %v1616_v49 = vsel %vm819_vm5, %v1615_v47, %v1612_v48 }
 0xfca   : > { %v1617_v50 = vpack.c.bf16 %v1616_v49, %v1616_v49 }
 0xfcc   : > { %2253 = vmatmul.mubr.msk.bf16.vlgmr.msra.gmra.mrb[40].mxu0 %vm304_vm1, %v1617_v50 }
 0xfcd   : > { %2272 = vmatprep.mubr.msk.bf16.mxu0 %vm2583_vm0, %v2582_v0  ;;  %2265 = vmatpush3.bf16.msra.mxu0 %v2373_v4 }
 0xfce   : > { %2266 = vmatprep.subr.bf16.mxu0 %v2582_v0 }
 0xfd1   : > { %2267 = vmatpush3.bf16.msra.mxu0 %v2374_v6 }
 0xfd2   : > { %2268 = vmatprep.subr.bf16.mxu0 %v2582_v0 }
 0xfd5   : > { %2269 = vmatpush3.bf16.msra.mxu0 %v2375_v17 }
 0xfd6   : > { %2270 = vmatprep.subr.bf16.mxu0 %v2582_v0 }
 0xfd9   : > { %2271 = vmatpush3.bf16.msra.mxu0 %v2376_v7 }
0x109f   : > { %v1671_v24 = vpop.f32.mrb[40].mxu0 }
0x10a0   : > { %v1672_v52 = vadd.f32 %v2026_v51, %v1671_v24  ;;  %v2254_v53 = vpop.f32.mrb[41].mxu0 }
0x10a1   : > { %v1674_v54 = vpop.f32.mrb[42].mxu0 }
0x10a2   : > { %v2255_v55 = vpop.f32.mrb[43].mxu0  ;;  %v1677_v56 = vadd.f32 %v1672_v52, %v2939_v58 }
0x10a4   : > { %v1678_v57 = vsel %vm304_vm1, %v1677_v56, 0.0 }
0x10a5   : > { %1679 = vadd.xlane.f32.xlu0 %v1678_v57 }
0x1132   : > { %v1680_v59 = vpop.xlane.xlu0 %1679 }
0x1133   : > { %v1681_v60 = vmul.f32 0.03125, %v1680_v59 }
0x1135   : > { %v1682_v61 = vsub.f32 %v1677_v56, %v1681_v60 }
0x1137   : > { %v1683_v62 = vmul.f32 %v1682_v61, %v1682_v61 }
0x1139   : > { %v1684_v63 = vsel %vm304_vm1, %v1683_v62, 0.0 }
0x113a   : > { %1685 = vadd.xlane.f32.xlu1 %v1684_v63 }
0x11c7   : > { %v1686_v58 = vpop.xlane.xlu1 %1685 }
0x11c8   : > { %v1687_v8 = vmul.f32 0.03125, %v1686_v58 }
0x11ca   : > { %v1688_v9 = vadd.f32 1e-05, %v1687_v8 }
0x11cc   : > { %2413 = vrsqrt.f32 %v1688_v9 }
0x11d6   : > { %v2414_v10 = vpop.eup %2413 }
0x11d7   : > { %v1690_v13 = vmul.f32 %v2414_v10, %v1682_v61 }
0x11d9   : > { %v1695_v3 = vmul.f32 %v2030_v11, %v1690_v13 }
0x11db   : > { %v1700_v5 = vadd.f32 %v2031_v14, %v1695_v3 }
0x11dd   : > { %v1701_v16 = vpack.c.bf16 %v1700_v5, %v1700_v5 }
0x11df   : > { %2261 = vmatmul.mubr.msk.bf16.vlgmr.msra.gmra.mrb[44].mxu1 %vm304_vm1, %v1701_v16 }
0x12b2   : > { %v1755_v19 = vpop.f32.mrb[44].mxu1 }
0x12b3   : > { %v1756_v20 = vadd.f32 %v2032_v18, %v1755_v19  ;;  %v2262_v21 = vpop.f32.mrb[45].mxu1 }
0x12b4   : > { %v1758_v22 = vpop.f32.mrb[46].mxu1 }
0x12b5   : > { %v1761_v15 = vmax.f32 %v1756_v20, 0.0  ;;  %v2263_v23 = vpop.f32.mrb[47].mxu1 }
0x12b7   : > { %v1762_v25 = vpack.c.bf16 %v1761_v15, %v1761_v15 }
0x12b9   : > { %2273 = vmatmul.mubr.msk.bf16.vlgmr.msra.gmra.mrb[44].mxu0 %vm996_vm6, %v1762_v25 }
0x138c   : > { %v1828_v26 = vpop.f32.mrb[44].mxu0 }
0x138d   : > { %v1829_v27 = vadd.f32 %v2036_v12, %v1828_v26  ;;  %v2274_v28 = vpop.f32.mrb[45].mxu0 }
0x138e   : > { %v1831_v29 = vpop.f32.mrb[46].mxu0 }
0x138f   : > { %v2275_v30 = vpop.f32.mrb[47].mxu0  ;;  %v1834_v31 = vadd.f32 %v1829_v27, %v1700_v5 }
0x1391   : > { %v1835_v0 = vsel %vm304_vm1, %v1834_v31, 0.0 }
0x1392   : > { %1836 = vadd.xlane.f32.xlu0 %v1835_v0 }
0x141f   : > { %v1837_v32 = vpop.xlane.xlu0 %1836 }
0x1420   : > { %v1838_v33 = vmul.f32 0.03125, %v1837_v32 }
0x1422   : > { %v1839_v34 = vsub.f32 %v1834_v31, %v1838_v33 }
0x1424   : > { %v1840_v35 = vmul.f32 %v1839_v34, %v1839_v34 }
0x1426   : > { %v1841_v36 = vsel %vm304_vm1, %v1840_v35, 0.0 }
0x1427   : > { %1842 = vadd.xlane.f32.xlu0 %v1841_v36 }
0x14b4   : > { %v1843_v37 = vpop.xlane.xlu0 %1842 }
0x14b5   : > { %v1844_v38 = vmul.f32 0.03125, %v1843_v37 }
0x14b7   : > { %v1845_v39 = vadd.f32 1e-05, %v1844_v38 }
0x14b9   : > { %2415 = vrsqrt.f32 %v1845_v39 }
0x14c3   : > { %v2416_v40 = vpop.eup %2415 }
0x14c4   : > { %v1847_v42 = vmul.f32 %v2416_v40, %v1839_v34 }
0x14c6   : > { %v1852_v44 = vmul.f32 %v2042_v41, %v1847_v42 }
0x14c8   : > { %v1857_v45 = vadd.f32 %v2043_v43, %v1852_v44 }
0x14ca   : > { %1858 = vst.msk [vmem:[%s252_s9] sm:$0xff] %vm304_vm1, %v1857_v45 }
0x14cb   : > { %2516 = shalt.err (!%p2513_p13)
}
0x14cc   : > { %s2517_s5 = scalar_lea.hbm %s3055_s30, 128  ;;  %s2521_s24 = scalar_lea.hbm %s3104_s4, 256 }
0x14cd   : > { %p2518_p6 = scmp.ne.s32.totalorder %s3055_s30, %s2517_s5  ;;  %p2522_p7 = scmp.lt.u32.totalorder %s3055_s30, %s3104_s4 }
0x14ce   : > { %p2523_p8 = scmp.lt.u32.totalorder %s2521_s24, %s2517_s5  ;;  %p2525_p0 = scmp.lt.u32.totalorder %s2517_s5, %s3055_s30 }
0x14cf   : > { %p2519_p10 = pnand %p2518_p6, %p3118_p1 }
0x14d0   : > { %p2524_p11 = por %p2523_p8, %p2522_p7 }
0x14d1   : > { %p2520_p4 = pneg %p2519_p10 }
0x14d2   : > { %p2526_p3 = por %p2525_p0, %p2524_p11 }
0x14d4   : > { %p2527_p5 = pnand %p2526_p3, %p2520_p4 }
0x14d6   : > { %2530 = shalt.err (!%p2527_p5)
}
0x14d7   : > { %2286 = dma.vmem_to_hbm [thread:$0]  (%p3118_p1), %s3057_s10, 128, %s3055_s30, %s1860_s6  }
0x14d8 PF: > { %s1885_s27 = sand.u32 1, %s2561_s15   ;;  %p3119_p9 = scmp.ne.s32.totalorder %s3109_s22, 0 }
0x14d9   : > { %p3120_p12 = scmp.ge.s32.totalorder %s2573_s18, 2  ;;  %s1886_s29 = scalar_lea.sflag [#allocation4], %s1885_s27 }
0x14db   : > { %p2300_p2 = pnand %p3120_p12, %p3119_p9 }
0x14dd   : > { %2556 = dma.done.wait (!%p2300_p2), %s1886_s29, 128  }
0x14de   : > { %2558 = vsyncadd (!%p2300_p2), %s1886_s29, 4294967168  ;;  %p18_p13 = scmp.ge.s32.totalorder %s2728_s11, 4   ;;  %s3121_s15 = smov %s2565_s16 }
0x14df   : > { %s3122_s16 = smov %s2569_s17  ;;  %s3123_s17 = smov %s2737_s14 }
0x14e0   : > { %s3124_s18 = smov %s2728_s11  ;;  %20 = sbr.rel (!%p18_p13) target bundleno = 6 (0x6), region = 94 }
0x14e7   :  { %1891 = vsyncpa [#allocation3], 1 }
0x14e8   :  { %1893 = vsyncpa [#allocation3 + $0x1], 1 }
0x14e9   :  { %1894 = vsyncpa [#allocation6], 1 }
0x14ea   :  { %1895 = vsyncpa [#allocation4], 1 }
0x14eb   :  { %1897 = vsyncpa [#allocation4 + $0x1], 1 }

</bundles_post_ra>
